<compile_context>
chip_gen: v7x
topology: tpu7x:2x2x1
jax: 0.10.0
libtpu: 0.0.40
codegen_flags: <defaults>
</compile_context>

<pallas_src>
import jax
import jax.numpy as jnp
from jax.experimental import pallas as pl
from jax.experimental.pallas import tpu as pltpu

# ----- social_stgcnn default hyperparameters -----
N_STGCNN = 1
N_TXPCNN = 1
INPUT_FEAT = 2
OUTPUT_FEAT = 5
SEQ_LEN = 8
PRED_SEQ_LEN = 12
KERNEL_SIZE = 3
BN_EPS = 1e-5

V_NODES = 16                 # graph nodes (lanes per sample)
LANES = 128
NB = LANES // V_NODES        # samples packed into the lane axis per grid step (= 8)
CPAD = 8                     # channels padded to a full sublane tile in the (t, c) layout


# ---------------------------------------------------------------------------
# Fused kernel: st_gcn  +  .view  +  txpcnn (conv3x3 -> PReLU -> conv3x3)
#
# Activation layout: 2-D (rows, 128 lanes), lanes = (sample_in_slab, node), rows =
#   (t, c_pad)      for the gcn/adjacency stage (sublane-tile aligned per timestep)
#   (c, t) torch-flat == (ch, h) txpcnn-flat afterwards (the torch .view is free).
# ---------------------------------------------------------------------------
def _social_stgcnn_kernel(x0_ref, ablk_ref, mg_ref, bg_ref, sh1_ref, mt_ref, bt_ref,
                          mr_ref, br_ref, m1_ref, b1_ref, m2_ref, b2_ref,
                          smat_ref, alpha_ref, o_ref):
    f32 = jnp.float32
    t = ablk_ref.shape[0]
    cpad = mg_ref.shape[0] // t

    x0 = x0_ref[...]                                           # (Ci*T, 128)

    # ---- gcn 1x1 conv (channel mix; BN1 scale folded), rows -> padded (t, c) order ----
    xg = jnp.dot(mg_ref[...], x0, preferred_element_type=f32) + bg_ref[...]   # (64, 128)

    # ---- adjacency 'nctv,tvw->nctw': per-timestep lane mix by blockdiag_NB(A[t]);
    #      each timestep block is one aligned sublane tile, A blocks streamed from VMEM ----
    xa = jnp.concatenate(
        [jnp.dot(xg[i * cpad:(i + 1) * cpad, :], ablk_ref[i],
                 preferred_element_type=f32) for i in range(t)], axis=0)       # (64, 128)

    a1 = alpha_ref[0]
    a2 = alpha_ref[1]
    a3 = alpha_ref[2]

    # ---- BN1 shift + PReLU ----
    xb = xa + sh1_ref[...]
    xb = jnp.where(xb >= 0.0, xb, a1 * xb)

    # ---- temporal 3x1 conv + channel mix + BN2 (row op also folds the (t,c)->(c,t) unpad) ----
    xt = jnp.dot(mt_ref[...], xb, preferred_element_type=f32) + bt_ref[...]    # (40, 128)
    # ---- residual 1x1 conv + BNr ----
    xr = jnp.dot(mr_ref[...], x0, preferred_element_type=f32) + br_ref[...]    # (40, 128)
    y = xt + xr
    y = jnp.where(y >= 0.0, y, a2 * y)   # rows = torch-flat (c,t) == txpcnn (ch,h): view is free

    # ---- txpcnn: two 3x3 convs.
    #      W (+-1) shifts: right matmuls with precomputed per-sample-block shift operators
    #      (block-diagonal => no cross-sample leakage through the lane packing).
    #      (channel, height) mixing: per-kw row operators streamed from the 3-D refs
    #      (m1_ref[k] / m2_ref[k]) -> never materialized whole, no spill pressure. ----
    y_m = jnp.dot(y, smat_ref[0], preferred_element_type=f32)   # value from w-1 (0 at edge)
    y_p = jnp.dot(y, smat_ref[1], preferred_element_type=f32)   # value from w+1 (0 at edge)
    z1 = (jnp.dot(m1_ref[0], y_m, preferred_element_type=f32)
          + jnp.dot(m1_ref[1], y, preferred_element_type=f32)
          + jnp.dot(m1_ref[2], y_p, preferred_element_type=f32)) + b1_ref[...]  # (64, 128)
    z1 = jnp.where(z1 >= 0.0, z1, a3 * z1)

    z1_m = jnp.dot(z1, smat_ref[0], preferred_element_type=f32)
    z1_p = jnp.dot(z1, smat_ref[1], preferred_element_type=f32)
    z2 = (jnp.dot(m2_ref[0], z1_m, preferred_element_type=f32)
          + jnp.dot(m2_ref[1], z1, preferred_element_type=f32)
          + jnp.dot(m2_ref[2], z1_p, preferred_element_type=f32)) + b2_ref[...]  # (64, 128)

    o_ref[...] = z2[: o_ref.shape[0], :]                        # rows = (pred_channel, height)


# ---------------------------------------------------------------------------
# Parameter folding / operator packing (plain JAX glue; depends only on the weights,
# NOT on the batch size, so in deployment it is computed once and cached).
# ---------------------------------------------------------------------------
def fold_bn(gamma, beta, mean, var):
    scale = gamma / jnp.sqrt(var + BN_EPS)
    shift = beta - mean * scale
    return scale, shift


def _pack_params(P):
    f32 = jnp.float32
    ci, co, t = INPUT_FEAT, OUTPUT_FEAT, SEQ_LEN
    pred, h = PRED_SEQ_LEN, OUTPUT_FEAT
    rows_s = co * t            # 40  torch-flat st_gcn rows (c, t)
    rows_g = CPAD * t          # 64  padded (t, c) gcn rows (one sublane tile per timestep)
    rows_p = pred * h          # 60  txpcnn rows (ch, h)
    rows_pp = 64               # padded to a sublane-tile multiple

    s1, sh1 = fold_bn(P['bn1_gamma'], P['bn1_beta'], P['bn1_mean'], P['bn1_var'])
    s2, sh2 = fold_bn(P['bn2_gamma'], P['bn2_beta'], P['bn2_mean'], P['bn2_var'])
    sr, shr = fold_bn(P['bnr_gamma'], P['bnr_beta'], P['bnr_mean'], P['bnr_var'])

    eye_t = jnp.eye(t, dtype=f32)

    # permutation/pad: torch-flat row (c*T + t) -> padded row (t*CPAD + c)
    rows = jnp.arange(rows_g)
    t_idx, c_idx = rows // CPAD, rows % CPAD
    src = c_idx * t + t_idx
    perm_pad = ((c_idx < co)[:, None]
                & (src[:, None] == jnp.arange(rows_s)[None, :])).astype(f32)    # (64, 40)

    # gcn 1x1 conv, BN1 scale folded (legal: per-row scale commutes with the lane-mix A)
    wg_f = (s1[:, None] * P['gcn_w']).astype(f32)                   # (co, ci)
    mg = (perm_pad @ jnp.kron(wg_f, eye_t)).astype(f32)             # (64, ci*T)
    bg = (perm_pad @ jnp.repeat(s1 * P['gcn_b'], t))[:, None].astype(f32)
    sh1c = (perm_pad @ jnp.repeat(sh1, t))[:, None].astype(f32)

    # temporal conv (k=3 over t, zero pad) + channel mix + BN2; input = padded (t,c) rows,
    # output = torch-flat (c,t) rows
    wt_f = (s2[:, None, None] * P['tcn_w']).astype(f32)             # (co, co, 3)
    m_ct = sum(jnp.kron(wt_f[:, :, k], jnp.eye(t, k=k - 1, dtype=f32)) for k in range(3))
    mt = (m_ct @ perm_pad.T).astype(f32)                            # (40, 64)
    bt = jnp.repeat(s2 * P['tcn_b'] + sh2, t)[:, None].astype(f32)

    # residual 1x1 conv + BNr folded
    wr_f = (sr[:, None] * P['res_w']).astype(f32)
    mr = jnp.kron(wr_f, eye_t).astype(f32)                          # (40, ci*T)
    br = jnp.repeat(sr * P['res_b'] + shr, t)[:, None].astype(f32)

    # txpcnn 3x3 convs: per-kw (channel, height) row operators (H shifts block-banded via
    # eye(h, k=kh-1)), zero-padded to 64 rows so intermediates stay sublane aligned.
    # Note: the three kw taps are kept as separate (64, .) slices of one 3-D array and
    # streamed from VMEM per tap (review item 1); fusing them into a single (192, .)
    # operator would not deepen the contraction here and only raises vreg pressure.
    def conv_row_op(w, in_rows):
        mats = []
        for kw in range(3):
            m = sum(jnp.kron(w[:, :, kh, kw], jnp.eye(h, k=kh - 1, dtype=f32))
                    for kh in range(3))                             # (c_out*h, c_in*h)
            m = jnp.pad(m, ((0, rows_pp - m.shape[0]), (0, in_rows - m.shape[1])))
            mats.append(m)
        return jnp.stack(mats, axis=0).astype(f32)

    m1 = conv_row_op(P['tp0_w'].astype(f32), rows_s)                # (3, 64, 40)
    m2 = conv_row_op(P['tpo_w'].astype(f32), rows_pp)               # (3, 64, 64)
    b1 = jnp.pad(jnp.repeat(P['tp0_b'], h), (0, rows_pp - rows_p))[:, None].astype(f32)
    b2 = jnp.pad(jnp.repeat(P['tpo_b'], h), (0, rows_pp - rows_p))[:, None].astype(f32)

    # per-sample-block +-1 lane-shift operators (block-diagonal: packed samples never mix,
    # edges zeroed).  Hoisted constants; ride the (idle) MXU as full 128-wide contractions.
    eye_nb = jnp.eye(NB, dtype=f32)
    smat = jnp.stack(
        [jnp.kron(eye_nb, jnp.eye(V_NODES, k=1, dtype=f32)),        # (y@smat[0])[.,w] = y[.,w-1]
         jnp.kron(eye_nb, jnp.eye(V_NODES, k=-1, dtype=f32))],      # (y@smat[1])[.,w] = y[.,w+1]
        axis=0)                                                     # (2, 128, 128)

    alphas = jnp.concatenate([P['alpha1'], P['alpha2'], P['tp_alpha']]).astype(f32)

    return dict(mg=mg, bg=bg, sh1=sh1c, mt=mt, bt=bt, mr=mr, br=br,
                m1=m1, b1=b1, m2=m2, b2=b2, smat=smat, alphas=alphas)


def init_params(key):
    keys = list(jax.random.split(key, 32))
    kit = iter(keys)

    def nrm(shape, scale=0.1):
        return (scale * jax.random.normal(next(kit), shape)).astype(jnp.float32)

    P = {}
    P['gcn_w'] = nrm((OUTPUT_FEAT, INPUT_FEAT))
    P['gcn_b'] = nrm((OUTPUT_FEAT,))
    P['tcn_w'] = nrm((OUTPUT_FEAT, OUTPUT_FEAT, KERNEL_SIZE))
    P['tcn_b'] = nrm((OUTPUT_FEAT,))
    P['res_w'] = nrm((OUTPUT_FEAT, INPUT_FEAT))
    P['res_b'] = nrm((OUTPUT_FEAT,))
    for tag in ('bn1', 'bn2', 'bnr'):
        P[tag + '_gamma'] = 1.0 + nrm((OUTPUT_FEAT,), 0.05)
        P[tag + '_beta'] = nrm((OUTPUT_FEAT,), 0.05)
        P[tag + '_mean'] = nrm((OUTPUT_FEAT,), 0.05)
        P[tag + '_var'] = 1.0 + jnp.abs(nrm((OUTPUT_FEAT,), 0.1))
    P['alpha1'] = jnp.array([0.25], jnp.float32)
    P['alpha2'] = jnp.array([0.20], jnp.float32)
    P['tp_alpha'] = jnp.array([0.30], jnp.float32)
    P['tp0_w'] = nrm((PRED_SEQ_LEN, SEQ_LEN, 3, 3))
    P['tp0_b'] = nrm((PRED_SEQ_LEN,))
    P['tpo_w'] = nrm((PRED_SEQ_LEN, PRED_SEQ_LEN, 3, 3))
    P['tpo_b'] = nrm((PRED_SEQ_LEN,))
    return P


# ---------------------------------------------------------------------------
# Forward pass wrapper: lane-pack 8 samples per grid step, one pallas_call.
# ---------------------------------------------------------------------------
def social_stgcnn_forward(v, a, P):
    # v: (N, input_feat, T=seq_len, V);  a: (seq_len, V, V)
    n, ci, t, nodes = v.shape
    assert ci == INPUT_FEAT and t == SEQ_LEN and nodes == V_NODES
    f32 = jnp.float32
    co, pred = OUTPUT_FEAT, PRED_SEQ_LEN
    rows_out = pred * co                   # 60
    lanes = NB * nodes                     # 128

    packed = _pack_params(P)

    # lane-pack NB samples per grid step: rows=(channel,time|height), lanes=(sample,node)
    g = -(-n // NB)
    n_pad = g * NB
    v_p = jnp.pad(v.astype(f32), ((0, n_pad - n), (0, 0), (0, 0), (0, 0)))
    x0 = v_p.reshape(g, NB, ci, t, nodes).transpose(0, 2, 3, 1, 4).reshape(g, ci * t, lanes)

    # adjacency blocks: blockdiag over the NB packed samples, one (128,128) per timestep
    a_blk = jnp.einsum('ij,tvw->tivjw', jnp.eye(NB, dtype=f32),
                       a.astype(f32)).reshape(t, lanes, lanes)

    def resident(arr):
        # weight operators: same block every grid step (constant index_map) -> VMEM-resident
        nd = arr.ndim
        return pl.BlockSpec(arr.shape, lambda i: (0,) * nd)

    in_specs = [
        pl.BlockSpec((None, ci * t, lanes), lambda i: (i, 0, 0)),    # x0 advances with the grid
        resident(a_blk), resident(packed['mg']), resident(packed['bg']),
        resident(packed['sh1']), resident(packed['mt']), resident(packed['bt']),
        resident(packed['mr']), resident(packed['br']), resident(packed['m1']),
        resident(packed['b1']), resident(packed['m2']), resident(packed['b2']),
        resident(packed['smat']),
        pl.BlockSpec(memory_space=pltpu.MemorySpace.SMEM),           # PReLU alphas (scalars)
    ]
    out_specs = pl.BlockSpec((None, rows_out, lanes), lambda i: (i, 0, 0))

    fused = pl.pallas_call(
        _social_stgcnn_kernel,
        grid=(g,),
        in_specs=in_specs,
        out_specs=out_specs,
        out_shape=jax.ShapeDtypeStruct((g, rows_out, lanes), f32),
        compiler_params=pltpu.CompilerParams(
            # one grid axis over 8-sample slabs: shards across v7x's two TensorCores,
            # plain serial loop on v5e/v6e (>=8 samples/step amortizes per-step overhead).
            dimension_semantics=("parallel",),
            # ~0.9 MiB actually used per step; cap well inside v7x's 64 MiB physical VMEM.
            vmem_limit_bytes=32 * 1024 * 1024,
        ),
    )
    y = fused(x0, a_blk, packed['mg'], packed['bg'], packed['sh1'], packed['mt'],
              packed['bt'], packed['mr'], packed['br'], packed['m1'], packed['b1'],
              packed['m2'], packed['b2'], packed['smat'], packed['alphas'])    # (g, 60, 128)

    # unpack lanes -> samples; the torch `.view`s are pure flat-row-index reinterpretations
    # already baked into the row layout, so only cheap wrapper reshapes remain here.
    out = y.reshape(g, rows_out, NB, nodes).transpose(0, 2, 1, 3)
    out = out.reshape(n_pad, rows_out * nodes)[:n].reshape(n, co, pred, nodes)
    return out, a


# ---------------------------------------------------------------------------
# Plain-JAX reference (for self-check only)
# ---------------------------------------------------------------------------
def reference_forward(v, a, P):
    hp = jax.lax.Precision.HIGHEST

    def conv2d(x, w, b, pad):
        y = jax.lax.conv_general_dilated(
            x, w, window_strides=(1, 1), padding=pad,
            dimension_numbers=('NCHW', 'OIHW', 'NCHW'), precision=hp)
        return y + b.reshape(1, -1, 1, 1)

    def bn(x, g, be, m, var):
        s = g / jnp.sqrt(var + BN_EPS)
        return x * s.reshape(1, -1, 1, 1) + (be - m * s).reshape(1, -1, 1, 1)

    def prelu(x, alpha):
        return jnp.where(x >= 0, x, alpha * x)

    x = v.astype(jnp.float32)
    res = bn(conv2d(x, P['res_w'].reshape(OUTPUT_FEAT, INPUT_FEAT, 1, 1),
                    P['res_b'], [(0, 0), (0, 0)]),
             P['bnr_gamma'], P['bnr_beta'], P['bnr_mean'], P['bnr_var'])
    xg = conv2d(x, P['gcn_w'].reshape(OUTPUT_FEAT, INPUT_FEAT, 1, 1),
                P['gcn_b'], [(0, 0), (0, 0)])
    xa = jnp.einsum('nctv,tvw->nctw', xg, a, precision=hp)
    xb = prelu(bn(xa, P['bn1_gamma'], P['bn1_beta'], P['bn1_mean'], P['bn1_var']),
               P['alpha1'][0])
    xt = conv2d(xb, P['tcn_w'].reshape(OUTPUT_FEAT, OUTPUT_FEAT, 3, 1),
                P['tcn_b'], [(1, 1), (0, 0)])
    xt = bn(xt, P['bn2_gamma'], P['bn2_beta'], P['bn2_mean'], P['bn2_var'])
    y = prelu(xt + res, P['alpha2'][0])

    N, _, _, V = y.shape
    y = y.reshape(N, SEQ_LEN, OUTPUT_FEAT, V)
    y = prelu(conv2d(y, P['tp0_w'], P['tp0_b'], [(1, 1), (1, 1)]), P['tp_alpha'][0])
    y = conv2d(y, P['tpo_w'], P['tpo_b'], [(1, 1), (1, 1)])
    y = y.reshape(N, OUTPUT_FEAT, PRED_SEQ_LEN, V)
    return y, a


# ---------------------------------------------------------------------------
if __name__ == "__main__":
    key = jax.random.PRNGKey(0)
    kv, ka, kp = jax.random.split(key, 3)
    P = init_params(kp)

    fwd = jax.jit(social_stgcnn_forward)

    # n=2: single 8-sample slab (one grid step); n=11: two grid steps + lane padding.
    for n in (2, 11):
        kvi = jax.random.fold_in(kv, n)
        kai = jax.random.fold_in(ka, n)
        v = jax.random.normal(kvi, (n, INPUT_FEAT, SEQ_LEN, V_NODES), jnp.float32)
        a = jax.random.normal(kai, (SEQ_LEN, V_NODES, V_NODES), jnp.float32)

        out, a_out = fwd(v, a, P)
        jax.block_until_ready(out)

        assert out.shape == (n, OUTPUT_FEAT, PRED_SEQ_LEN, V_NODES)
        assert a_out.shape == (SEQ_LEN, V_NODES, V_NODES)

        ref, _ = reference_forward(v, a, P)
        if not jnp.allclose(out, ref, atol=1e-2, rtol=1e-2):
            max_err = float(jnp.max(jnp.abs(out - ref)))
            raise AssertionError(f"Pallas mismatch vs reference (N={n}), max_abs_err={max_err}")

    print("KERNEL_OK")
</pallas_src>

<mosaic_0001>
module attributes {stable_mosaic.version = 11 : i64} {
  func.func @_social_stgcnn_kernel(%arg0: i32, %arg1: memref<1x16x128xf32, #tpu.memory_space<vmem>>, %arg2: memref<8x128x128xf32, #tpu.memory_space<vmem>>, %arg3: memref<64x16xf32, #tpu.memory_space<vmem>>, %arg4: memref<64x1xf32, #tpu.memory_space<vmem>>, %arg5: memref<64x1xf32, #tpu.memory_space<vmem>>, %arg6: memref<40x64xf32, #tpu.memory_space<vmem>>, %arg7: memref<40x1xf32, #tpu.memory_space<vmem>>, %arg8: memref<40x16xf32, #tpu.memory_space<vmem>>, %arg9: memref<40x1xf32, #tpu.memory_space<vmem>>, %arg10: memref<3x64x40xf32, #tpu.memory_space<vmem>>, %arg11: memref<64x1xf32, #tpu.memory_space<vmem>>, %arg12: memref<3x64x64xf32, #tpu.memory_space<vmem>>, %arg13: memref<64x1xf32, #tpu.memory_space<vmem>>, %arg14: memref<2x128x128xf32, #tpu.memory_space<vmem>>, %arg15: memref<3xf32, #tpu.memory_space<smem>>, %arg16: memref<1x60x128xf32, #tpu.memory_space<vmem>>) attributes {dimension_semantics = [#tpu.dimension_semantics<parallel>], iteration_bounds = array<i64: 1>, scalar_prefetch = 0 : i64, scratch_operands = 0 : i64, tpu.core_type = #tpu.core_type<tc>, window_params = [{transform_indices = @transform_0, window_bounds = array<i64: 1, 16, 128>}, {pipeline_mode = #tpu.pipeline_mode<synchronous>, transform_indices = @transform_1, window_bounds = array<i64: 8, 128, 128>}, {pipeline_mode = #tpu.pipeline_mode<synchronous>, transform_indices = @transform_2, window_bounds = array<i64: 64, 16>}, {pipeline_mode = #tpu.pipeline_mode<synchronous>, transform_indices = @transform_3, window_bounds = array<i64: 64, 1>}, {pipeline_mode = #tpu.pipeline_mode<synchronous>, transform_indices = @transform_4, window_bounds = array<i64: 64, 1>}, {pipeline_mode = #tpu.pipeline_mode<synchronous>, transform_indices = @transform_5, window_bounds = array<i64: 40, 64>}, {pipeline_mode = #tpu.pipeline_mode<synchronous>, transform_indices = @transform_6, window_bounds = array<i64: 40, 1>}, {pipeline_mode = #tpu.pipeline_mode<synchronous>, transform_indices = @transform_7, window_bounds = array<i64: 40, 16>}, {pipeline_mode = #tpu.pipeline_mode<synchronous>, transform_indices = @transform_8, window_bounds = array<i64: 40, 1>}, {pipeline_mode = #tpu.pipeline_mode<synchronous>, transform_indices = @transform_9, window_bounds = array<i64: 3, 64, 40>}, {pipeline_mode = #tpu.pipeline_mode<synchronous>, transform_indices = @transform_10, window_bounds = array<i64: 64, 1>}, {pipeline_mode = #tpu.pipeline_mode<synchronous>, transform_indices = @transform_11, window_bounds = array<i64: 3, 64, 64>}, {pipeline_mode = #tpu.pipeline_mode<synchronous>, transform_indices = @transform_12, window_bounds = array<i64: 64, 1>}, {pipeline_mode = #tpu.pipeline_mode<synchronous>, transform_indices = @transform_13, window_bounds = array<i64: 2, 128, 128>}, {transform_indices = @transform_14, window_bounds = array<i64: 3>}, {transform_indices = @transform_15, window_bounds = array<i64: 1, 60, 128>}]} {
    %c0 = arith.constant 0 : index
    %c0_0 = arith.constant 0 : index
    %c0_1 = arith.constant 0 : index
    %0 = vector.load %arg1[%c0, %c0_0, %c0_1] : memref<1x16x128xf32, #tpu.memory_space<vmem>>, vector<1x16x128xf32>
    %1 = vector.shape_cast %0 : vector<1x16x128xf32> to vector<16x128xf32>
    %c0_2 = arith.constant 0 : index
    %c0_3 = arith.constant 0 : index
    %2 = vector.load %arg3[%c0_2, %c0_3] : memref<64x16xf32, #tpu.memory_space<vmem>>, vector<64x16xf32>
    %cst = arith.constant dense<0.000000e+00> : vector<64x128xf32>
    %3 = tpu.matmul %2, %1, %cst {dimension_numbers = #tpu.dot_dimension_numbers<[1], [0], [0], [1], [0, 0, 1, 1], [], []>} : vector<64x16xf32>, vector<16x128xf32>, vector<64x128xf32> -> vector<64x128xf32>
    %c0_4 = arith.constant 0 : index
    %c0_5 = arith.constant 0 : index
    %4 = vector.load %arg4[%c0_4, %c0_5] : memref<64x1xf32, #tpu.memory_space<vmem>>, vector<64x1xf32>
    %5 = vector.broadcast %4 : vector<64x1xf32> to vector<64x128xf32>
    %6 = arith.addf %3, %5 : vector<64x128xf32>
    %7 = vector.extract_strided_slice %6 {offsets = [0, 0], sizes = [8, 128], strides = [1, 1]} : vector<64x128xf32> to vector<8x128xf32>
    %c0_6 = arith.constant 0 : index
    %c0_7 = arith.constant 0 : index
    %c0_8 = arith.constant 0 : index
    %8 = vector.load %arg2[%c0_6, %c0_7, %c0_8] : memref<8x128x128xf32, #tpu.memory_space<vmem>>, vector<1x128x128xf32>
    %9 = vector.shape_cast %8 : vector<1x128x128xf32> to vector<128x128xf32>
    %cst_9 = arith.constant dense<0.000000e+00> : vector<8x128xf32>
    %10 = tpu.matmul %7, %9, %cst_9 {dimension_numbers = #tpu.dot_dimension_numbers<[1], [0], [0], [1], [0, 0, 1, 1], [], []>} : vector<8x128xf32>, vector<128x128xf32>, vector<8x128xf32> -> vector<8x128xf32>
    %11 = vector.extract_strided_slice %6 {offsets = [8, 0], sizes = [8, 128], strides = [1, 1]} : vector<64x128xf32> to vector<8x128xf32>
    %c1 = arith.constant 1 : index
    %c0_10 = arith.constant 0 : index
    %c0_11 = arith.constant 0 : index
    %12 = vector.load %arg2[%c1, %c0_10, %c0_11] : memref<8x128x128xf32, #tpu.memory_space<vmem>>, vector<1x128x128xf32>
    %13 = vector.shape_cast %12 : vector<1x128x128xf32> to vector<128x128xf32>
    %cst_12 = arith.constant dense<0.000000e+00> : vector<8x128xf32>
    %14 = tpu.matmul %11, %13, %cst_12 {dimension_numbers = #tpu.dot_dimension_numbers<[1], [0], [0], [1], [0, 0, 1, 1], [], []>} : vector<8x128xf32>, vector<128x128xf32>, vector<8x128xf32> -> vector<8x128xf32>
    %15 = vector.extract_strided_slice %6 {offsets = [16, 0], sizes = [8, 128], strides = [1, 1]} : vector<64x128xf32> to vector<8x128xf32>
    %c2 = arith.constant 2 : index
    %c0_13 = arith.constant 0 : index
    %c0_14 = arith.constant 0 : index
    %16 = vector.load %arg2[%c2, %c0_13, %c0_14] : memref<8x128x128xf32, #tpu.memory_space<vmem>>, vector<1x128x128xf32>
    %17 = vector.shape_cast %16 : vector<1x128x128xf32> to vector<128x128xf32>
    %cst_15 = arith.constant dense<0.000000e+00> : vector<8x128xf32>
    %18 = tpu.matmul %15, %17, %cst_15 {dimension_numbers = #tpu.dot_dimension_numbers<[1], [0], [0], [1], [0, 0, 1, 1], [], []>} : vector<8x128xf32>, vector<128x128xf32>, vector<8x128xf32> -> vector<8x128xf32>
    %19 = vector.extract_strided_slice %6 {offsets = [24, 0], sizes = [8, 128], strides = [1, 1]} : vector<64x128xf32> to vector<8x128xf32>
    %c3 = arith.constant 3 : index
    %c0_16 = arith.constant 0 : index
    %c0_17 = arith.constant 0 : index
    %20 = vector.load %arg2[%c3, %c0_16, %c0_17] : memref<8x128x128xf32, #tpu.memory_space<vmem>>, vector<1x128x128xf32>
    %21 = vector.shape_cast %20 : vector<1x128x128xf32> to vector<128x128xf32>
    %cst_18 = arith.constant dense<0.000000e+00> : vector<8x128xf32>
    %22 = tpu.matmul %19, %21, %cst_18 {dimension_numbers = #tpu.dot_dimension_numbers<[1], [0], [0], [1], [0, 0, 1, 1], [], []>} : vector<8x128xf32>, vector<128x128xf32>, vector<8x128xf32> -> vector<8x128xf32>
    %23 = vector.extract_strided_slice %6 {offsets = [32, 0], sizes = [8, 128], strides = [1, 1]} : vector<64x128xf32> to vector<8x128xf32>
    %c4 = arith.constant 4 : index
    %c0_19 = arith.constant 0 : index
    %c0_20 = arith.constant 0 : index
    %24 = vector.load %arg2[%c4, %c0_19, %c0_20] : memref<8x128x128xf32, #tpu.memory_space<vmem>>, vector<1x128x128xf32>
    %25 = vector.shape_cast %24 : vector<1x128x128xf32> to vector<128x128xf32>
    %cst_21 = arith.constant dense<0.000000e+00> : vector<8x128xf32>
    %26 = tpu.matmul %23, %25, %cst_21 {dimension_numbers = #tpu.dot_dimension_numbers<[1], [0], [0], [1], [0, 0, 1, 1], [], []>} : vector<8x128xf32>, vector<128x128xf32>, vector<8x128xf32> -> vector<8x128xf32>
    %27 = vector.extract_strided_slice %6 {offsets = [40, 0], sizes = [8, 128], strides = [1, 1]} : vector<64x128xf32> to vector<8x128xf32>
    %c5 = arith.constant 5 : index
    %c0_22 = arith.constant 0 : index
    %c0_23 = arith.constant 0 : index
    %28 = vector.load %arg2[%c5, %c0_22, %c0_23] : memref<8x128x128xf32, #tpu.memory_space<vmem>>, vector<1x128x128xf32>
    %29 = vector.shape_cast %28 : vector<1x128x128xf32> to vector<128x128xf32>
    %cst_24 = arith.constant dense<0.000000e+00> : vector<8x128xf32>
    %30 = tpu.matmul %27, %29, %cst_24 {dimension_numbers = #tpu.dot_dimension_numbers<[1], [0], [0], [1], [0, 0, 1, 1], [], []>} : vector<8x128xf32>, vector<128x128xf32>, vector<8x128xf32> -> vector<8x128xf32>
    %31 = vector.extract_strided_slice %6 {offsets = [48, 0], sizes = [8, 128], strides = [1, 1]} : vector<64x128xf32> to vector<8x128xf32>
    %c6 = arith.constant 6 : index
    %c0_25 = arith.constant 0 : index
    %c0_26 = arith.constant 0 : index
    %32 = vector.load %arg2[%c6, %c0_25, %c0_26] : memref<8x128x128xf32, #tpu.memory_space<vmem>>, vector<1x128x128xf32>
    %33 = vector.shape_cast %32 : vector<1x128x128xf32> to vector<128x128xf32>
    %cst_27 = arith.constant dense<0.000000e+00> : vector<8x128xf32>
    %34 = tpu.matmul %31, %33, %cst_27 {dimension_numbers = #tpu.dot_dimension_numbers<[1], [0], [0], [1], [0, 0, 1, 1], [], []>} : vector<8x128xf32>, vector<128x128xf32>, vector<8x128xf32> -> vector<8x128xf32>
    %35 = vector.extract_strided_slice %6 {offsets = [56, 0], sizes = [8, 128], strides = [1, 1]} : vector<64x128xf32> to vector<8x128xf32>
    %c7 = arith.constant 7 : index
    %c0_28 = arith.constant 0 : index
    %c0_29 = arith.constant 0 : index
    %36 = vector.load %arg2[%c7, %c0_28, %c0_29] : memref<8x128x128xf32, #tpu.memory_space<vmem>>, vector<1x128x128xf32>
    %37 = vector.shape_cast %36 : vector<1x128x128xf32> to vector<128x128xf32>
    %cst_30 = arith.constant dense<0.000000e+00> : vector<8x128xf32>
    %38 = tpu.matmul %35, %37, %cst_30 {dimension_numbers = #tpu.dot_dimension_numbers<[1], [0], [0], [1], [0, 0, 1, 1], [], []>} : vector<8x128xf32>, vector<128x128xf32>, vector<8x128xf32> -> vector<8x128xf32>
    %39 = tpu.concatenate %10, %14, %18, %22, %26, %30, %34, %38 in 0 : vector<8x128xf32>, vector<8x128xf32>, vector<8x128xf32>, vector<8x128xf32>, vector<8x128xf32>, vector<8x128xf32>, vector<8x128xf32>, vector<8x128xf32> -> vector<64x128xf32>
    %c0_31 = arith.constant 0 : index
    %40 = memref.load %arg15[%c0_31] : memref<3xf32, #tpu.memory_space<smem>>
    %c1_32 = arith.constant 1 : index
    %41 = memref.load %arg15[%c1_32] : memref<3xf32, #tpu.memory_space<smem>>
    %c2_33 = arith.constant 2 : index
    %42 = memref.load %arg15[%c2_33] : memref<3xf32, #tpu.memory_space<smem>>
    %c0_34 = arith.constant 0 : index
    %c0_35 = arith.constant 0 : index
    %43 = vector.load %arg5[%c0_34, %c0_35] : memref<64x1xf32, #tpu.memory_space<vmem>>, vector<64x1xf32>
    %44 = vector.broadcast %43 : vector<64x1xf32> to vector<64x128xf32>
    %45 = arith.addf %39, %44 : vector<64x128xf32>
    %cst_36 = arith.constant 0.000000e+00 : f32
    %46 = vector.broadcast %cst_36 : f32 to vector<64x128xf32>
    %47 = arith.cmpf oge, %45, %46 : vector<64x128xf32>
    %48 = vector.broadcast %40 : f32 to vector<64x128xf32>
    %49 = arith.mulf %48, %45 : vector<64x128xf32>
    %50 = arith.select %47, %45, %49 : vector<64x128xi1>, vector<64x128xf32>
    %c0_37 = arith.constant 0 : index
    %c0_38 = arith.constant 0 : index
    %51 = vector.load %arg6[%c0_37, %c0_38] : memref<40x64xf32, #tpu.memory_space<vmem>>, vector<40x64xf32>
    %cst_39 = arith.constant dense<0.000000e+00> : vector<40x128xf32>
    %52 = tpu.matmul %51, %50, %cst_39 {dimension_numbers = #tpu.dot_dimension_numbers<[1], [0], [0], [1], [0, 0, 1, 1], [], []>} : vector<40x64xf32>, vector<64x128xf32>, vector<40x128xf32> -> vector<40x128xf32>
    %c0_40 = arith.constant 0 : index
    %c0_41 = arith.constant 0 : index
    %53 = vector.load %arg7[%c0_40, %c0_41] : memref<40x1xf32, #tpu.memory_space<vmem>>, vector<40x1xf32>
    %54 = vector.broadcast %53 : vector<40x1xf32> to vector<40x128xf32>
    %55 = arith.addf %52, %54 : vector<40x128xf32>
    %c0_42 = arith.constant 0 : index
    %c0_43 = arith.constant 0 : index
    %56 = vector.load %arg8[%c0_42, %c0_43] : memref<40x16xf32, #tpu.memory_space<vmem>>, vector<40x16xf32>
    %cst_44 = arith.constant dense<0.000000e+00> : vector<40x128xf32>
    %57 = tpu.matmul %56, %1, %cst_44 {dimension_numbers = #tpu.dot_dimension_numbers<[1], [0], [0], [1], [0, 0, 1, 1], [], []>} : vector<40x16xf32>, vector<16x128xf32>, vector<40x128xf32> -> vector<40x128xf32>
    %c0_45 = arith.constant 0 : index
    %c0_46 = arith.constant 0 : index
    %58 = vector.load %arg9[%c0_45, %c0_46] : memref<40x1xf32, #tpu.memory_space<vmem>>, vector<40x1xf32>
    %59 = vector.broadcast %58 : vector<40x1xf32> to vector<40x128xf32>
    %60 = arith.addf %57, %59 : vector<40x128xf32>
    %61 = arith.addf %55, %60 : vector<40x128xf32>
    %cst_47 = arith.constant 0.000000e+00 : f32
    %62 = vector.broadcast %cst_47 : f32 to vector<40x128xf32>
    %63 = arith.cmpf oge, %61, %62 : vector<40x128xf32>
    %64 = vector.broadcast %41 : f32 to vector<40x128xf32>
    %65 = arith.mulf %64, %61 : vector<40x128xf32>
    %66 = arith.select %63, %61, %65 : vector<40x128xi1>, vector<40x128xf32>
    %c0_48 = arith.constant 0 : index
    %c0_49 = arith.constant 0 : index
    %c0_50 = arith.constant 0 : index
    %67 = vector.load %arg14[%c0_48, %c0_49, %c0_50] : memref<2x128x128xf32, #tpu.memory_space<vmem>>, vector<1x128x128xf32>
    %68 = vector.shape_cast %67 : vector<1x128x128xf32> to vector<128x128xf32>
    %cst_51 = arith.constant dense<0.000000e+00> : vector<40x128xf32>
    %69 = tpu.matmul %66, %68, %cst_51 {dimension_numbers = #tpu.dot_dimension_numbers<[1], [0], [0], [1], [0, 0, 1, 1], [], []>} : vector<40x128xf32>, vector<128x128xf32>, vector<40x128xf32> -> vector<40x128xf32>
    %c1_52 = arith.constant 1 : index
    %c0_53 = arith.constant 0 : index
    %c0_54 = arith.constant 0 : index
    %70 = vector.load %arg14[%c1_52, %c0_53, %c0_54] : memref<2x128x128xf32, #tpu.memory_space<vmem>>, vector<1x128x128xf32>
    %71 = vector.shape_cast %70 : vector<1x128x128xf32> to vector<128x128xf32>
    %cst_55 = arith.constant dense<0.000000e+00> : vector<40x128xf32>
    %72 = tpu.matmul %66, %71, %cst_55 {dimension_numbers = #tpu.dot_dimension_numbers<[1], [0], [0], [1], [0, 0, 1, 1], [], []>} : vector<40x128xf32>, vector<128x128xf32>, vector<40x128xf32> -> vector<40x128xf32>
    %c0_56 = arith.constant 0 : index
    %c0_57 = arith.constant 0 : index
    %c0_58 = arith.constant 0 : index
    %73 = vector.load %arg10[%c0_56, %c0_57, %c0_58] : memref<3x64x40xf32, #tpu.memory_space<vmem>>, vector<1x64x40xf32>
    %74 = vector.shape_cast %73 : vector<1x64x40xf32> to vector<64x40xf32>
    %cst_59 = arith.constant dense<0.000000e+00> : vector<64x128xf32>
    %75 = tpu.matmul %74, %69, %cst_59 {dimension_numbers = #tpu.dot_dimension_numbers<[1], [0], [0], [1], [0, 0, 1, 1], [], []>} : vector<64x40xf32>, vector<40x128xf32>, vector<64x128xf32> -> vector<64x128xf32>
    %c1_60 = arith.constant 1 : index
    %c0_61 = arith.constant 0 : index
    %c0_62 = arith.constant 0 : index
    %76 = vector.load %arg10[%c1_60, %c0_61, %c0_62] : memref<3x64x40xf32, #tpu.memory_space<vmem>>, vector<1x64x40xf32>
    %77 = vector.shape_cast %76 : vector<1x64x40xf32> to vector<64x40xf32>
    %cst_63 = arith.constant dense<0.000000e+00> : vector<64x128xf32>
    %78 = tpu.matmul %77, %66, %cst_63 {dimension_numbers = #tpu.dot_dimension_numbers<[1], [0], [0], [1], [0, 0, 1, 1], [], []>} : vector<64x40xf32>, vector<40x128xf32>, vector<64x128xf32> -> vector<64x128xf32>
    %79 = arith.addf %75, %78 : vector<64x128xf32>
    %c2_64 = arith.constant 2 : index
    %c0_65 = arith.constant 0 : index
    %c0_66 = arith.constant 0 : index
    %80 = vector.load %arg10[%c2_64, %c0_65, %c0_66] : memref<3x64x40xf32, #tpu.memory_space<vmem>>, vector<1x64x40xf32>
    %81 = vector.shape_cast %80 : vector<1x64x40xf32> to vector<64x40xf32>
    %cst_67 = arith.constant dense<0.000000e+00> : vector<64x128xf32>
    %82 = tpu.matmul %81, %72, %cst_67 {dimension_numbers = #tpu.dot_dimension_numbers<[1], [0], [0], [1], [0, 0, 1, 1], [], []>} : vector<64x40xf32>, vector<40x128xf32>, vector<64x128xf32> -> vector<64x128xf32>
    %83 = arith.addf %79, %82 : vector<64x128xf32>
    %c0_68 = arith.constant 0 : index
    %c0_69 = arith.constant 0 : index
    %84 = vector.load %arg11[%c0_68, %c0_69] : memref<64x1xf32, #tpu.memory_space<vmem>>, vector<64x1xf32>
    %85 = vector.broadcast %84 : vector<64x1xf32> to vector<64x128xf32>
    %86 = arith.addf %83, %85 : vector<64x128xf32>
    %cst_70 = arith.constant 0.000000e+00 : f32
    %87 = vector.broadcast %cst_70 : f32 to vector<64x128xf32>
    %88 = arith.cmpf oge, %86, %87 : vector<64x128xf32>
    %89 = vector.broadcast %42 : f32 to vector<64x128xf32>
    %90 = arith.mulf %89, %86 : vector<64x128xf32>
    %91 = arith.select %88, %86, %90 : vector<64x128xi1>, vector<64x128xf32>
    %c0_71 = arith.constant 0 : index
    %c0_72 = arith.constant 0 : index
    %c0_73 = arith.constant 0 : index
    %92 = vector.load %arg14[%c0_71, %c0_72, %c0_73] : memref<2x128x128xf32, #tpu.memory_space<vmem>>, vector<1x128x128xf32>
    %93 = vector.shape_cast %92 : vector<1x128x128xf32> to vector<128x128xf32>
    %cst_74 = arith.constant dense<0.000000e+00> : vector<64x128xf32>
    %94 = tpu.matmul %91, %93, %cst_74 {dimension_numbers = #tpu.dot_dimension_numbers<[1], [0], [0], [1], [0, 0, 1, 1], [], []>} : vector<64x128xf32>, vector<128x128xf32>, vector<64x128xf32> -> vector<64x128xf32>
    %c1_75 = arith.constant 1 : index
    %c0_76 = arith.constant 0 : index
    %c0_77 = arith.constant 0 : index
    %95 = vector.load %arg14[%c1_75, %c0_76, %c0_77] : memref<2x128x128xf32, #tpu.memory_space<vmem>>, vector<1x128x128xf32>
    %96 = vector.shape_cast %95 : vector<1x128x128xf32> to vector<128x128xf32>
    %cst_78 = arith.constant dense<0.000000e+00> : vector<64x128xf32>
    %97 = tpu.matmul %91, %96, %cst_78 {dimension_numbers = #tpu.dot_dimension_numbers<[1], [0], [0], [1], [0, 0, 1, 1], [], []>} : vector<64x128xf32>, vector<128x128xf32>, vector<64x128xf32> -> vector<64x128xf32>
    %c0_79 = arith.constant 0 : index
    %c0_80 = arith.constant 0 : index
    %c0_81 = arith.constant 0 : index
    %98 = vector.load %arg12[%c0_79, %c0_80, %c0_81] : memref<3x64x64xf32, #tpu.memory_space<vmem>>, vector<1x64x64xf32>
    %99 = vector.shape_cast %98 : vector<1x64x64xf32> to vector<64x64xf32>
    %cst_82 = arith.constant dense<0.000000e+00> : vector<64x128xf32>
    %100 = tpu.matmul %99, %94, %cst_82 {dimension_numbers = #tpu.dot_dimension_numbers<[1], [0], [0], [1], [0, 0, 1, 1], [], []>} : vector<64x64xf32>, vector<64x128xf32>, vector<64x128xf32> -> vector<64x128xf32>
    %c1_83 = arith.constant 1 : index
    %c0_84 = arith.constant 0 : index
    %c0_85 = arith.constant 0 : index
    %101 = vector.load %arg12[%c1_83, %c0_84, %c0_85] : memref<3x64x64xf32, #tpu.memory_space<vmem>>, vector<1x64x64xf32>
    %102 = vector.shape_cast %101 : vector<1x64x64xf32> to vector<64x64xf32>
    %cst_86 = arith.constant dense<0.000000e+00> : vector<64x128xf32>
    %103 = tpu.matmul %102, %91, %cst_86 {dimension_numbers = #tpu.dot_dimension_numbers<[1], [0], [0], [1], [0, 0, 1, 1], [], []>} : vector<64x64xf32>, vector<64x128xf32>, vector<64x128xf32> -> vector<64x128xf32>
    %104 = arith.addf %100, %103 : vector<64x128xf32>
    %c2_87 = arith.constant 2 : index
    %c0_88 = arith.constant 0 : index
    %c0_89 = arith.constant 0 : index
    %105 = vector.load %arg12[%c2_87, %c0_88, %c0_89] : memref<3x64x64xf32, #tpu.memory_space<vmem>>, vector<1x64x64xf32>
    %106 = vector.shape_cast %105 : vector<1x64x64xf32> to vector<64x64xf32>
    %cst_90 = arith.constant dense<0.000000e+00> : vector<64x128xf32>
    %107 = tpu.matmul %106, %97, %cst_90 {dimension_numbers = #tpu.dot_dimension_numbers<[1], [0], [0], [1], [0, 0, 1, 1], [], []>} : vector<64x64xf32>, vector<64x128xf32>, vector<64x128xf32> -> vector<64x128xf32>
    %108 = arith.addf %104, %107 : vector<64x128xf32>
    %c0_91 = arith.constant 0 : index
    %c0_92 = arith.constant 0 : index
    %109 = vector.load %arg13[%c0_91, %c0_92] : memref<64x1xf32, #tpu.memory_space<vmem>>, vector<64x1xf32>
    %110 = vector.broadcast %109 : vector<64x1xf32> to vector<64x128xf32>
    %111 = arith.addf %108, %110 : vector<64x128xf32>
    %112 = vector.extract_strided_slice %111 {offsets = [0, 0], sizes = [60, 128], strides = [1, 1]} : vector<64x128xf32> to vector<60x128xf32>
    %c0_93 = arith.constant 0 : index
    %c0_94 = arith.constant 0 : index
    %c0_95 = arith.constant 0 : index
    %113 = vector.load %arg16[%c0_93, %c0_94, %c0_95] : memref<1x60x128xf32, #tpu.memory_space<vmem>>, vector<1x60x128xf32>
    %114 = vector.shape_cast %113 : vector<1x60x128xf32> to vector<60x128xf32>
    %115 = vector.shape_cast %112 : vector<60x128xf32> to vector<1x60x128xf32>
    tpu.vector_store %arg16[%c0_93, %c0_94, %c0_95], %115 {strides = array<i32>} : memref<1x60x128xf32, #tpu.memory_space<vmem>>, vector<1x60x128xf32>,
    return
  }
  func.func @transform_0(%arg0: i32) -> (i32, i32, i32) {
    %c0_i32 = arith.constant 0 : i32
    %c0_i32_0 = arith.constant 0 : i32
    %c0_i32_1 = arith.constant 0 : i32
    return %arg0, %c0_i32, %c0_i32_0 : i32, i32, i32
  }
  func.func @transform_1(%arg0: i32) -> (i32, i32, i32) {
    %c0_i32 = arith.constant 0 : i32
    %c0_i32_0 = arith.constant 0 : i32
    %c0_i32_1 = arith.constant 0 : i32
    %c0_i32_2 = arith.constant 0 : i32
    return %c0_i32, %c0_i32_0, %c0_i32_1 : i32, i32, i32
  }
  func.func @transform_2(%arg0: i32) -> (i32, i32) {
    %c0_i32 = arith.constant 0 : i32
    %c0_i32_0 = arith.constant 0 : i32
    %c0_i32_1 = arith.constant 0 : i32
    return %c0_i32, %c0_i32_0 : i32, i32
  }
  func.func @transform_3(%arg0: i32) -> (i32, i32) {
    %c0_i32 = arith.constant 0 : i32
    %c0_i32_0 = arith.constant 0 : i32
    %c0_i32_1 = arith.constant 0 : i32
    return %c0_i32, %c0_i32_0 : i32, i32
  }
  func.func @transform_4(%arg0: i32) -> (i32, i32) {
    %c0_i32 = arith.constant 0 : i32
    %c0_i32_0 = arith.constant 0 : i32
    %c0_i32_1 = arith.constant 0 : i32
    return %c0_i32, %c0_i32_0 : i32, i32
  }
  func.func @transform_5(%arg0: i32) -> (i32, i32) {
    %c0_i32 = arith.constant 0 : i32
    %c0_i32_0 = arith.constant 0 : i32
    %c0_i32_1 = arith.constant 0 : i32
    return %c0_i32, %c0_i32_0 : i32, i32
  }
  func.func @transform_6(%arg0: i32) -> (i32, i32) {
    %c0_i32 = arith.constant 0 : i32
    %c0_i32_0 = arith.constant 0 : i32
    %c0_i32_1 = arith.constant 0 : i32
    return %c0_i32, %c0_i32_0 : i32, i32
  }
  func.func @transform_7(%arg0: i32) -> (i32, i32) {
    %c0_i32 = arith.constant 0 : i32
    %c0_i32_0 = arith.constant 0 : i32
    %c0_i32_1 = arith.constant 0 : i32
    return %c0_i32, %c0_i32_0 : i32, i32
  }
  func.func @transform_8(%arg0: i32) -> (i32, i32) {
    %c0_i32 = arith.constant 0 : i32
    %c0_i32_0 = arith.constant 0 : i32
    %c0_i32_1 = arith.constant 0 : i32
    return %c0_i32, %c0_i32_0 : i32, i32
  }
  func.func @transform_9(%arg0: i32) -> (i32, i32, i32) {
    %c0_i32 = arith.constant 0 : i32
    %c0_i32_0 = arith.constant 0 : i32
    %c0_i32_1 = arith.constant 0 : i32
    %c0_i32_2 = arith.constant 0 : i32
    return %c0_i32, %c0_i32_0, %c0_i32_1 : i32, i32, i32
  }
  func.func @transform_10(%arg0: i32) -> (i32, i32) {
    %c0_i32 = arith.constant 0 : i32
    %c0_i32_0 = arith.constant 0 : i32
    %c0_i32_1 = arith.constant 0 : i32
    return %c0_i32, %c0_i32_0 : i32, i32
  }
  func.func @transform_11(%arg0: i32) -> (i32, i32, i32) {
    %c0_i32 = arith.constant 0 : i32
    %c0_i32_0 = arith.constant 0 : i32
    %c0_i32_1 = arith.constant 0 : i32
    %c0_i32_2 = arith.constant 0 : i32
    return %c0_i32, %c0_i32_0, %c0_i32_1 : i32, i32, i32
  }
  func.func @transform_12(%arg0: i32) -> (i32, i32) {
    %c0_i32 = arith.constant 0 : i32
    %c0_i32_0 = arith.constant 0 : i32
    %c0_i32_1 = arith.constant 0 : i32
    return %c0_i32, %c0_i32_0 : i32, i32
  }
  func.func @transform_13(%arg0: i32) -> (i32, i32, i32) {
    %c0_i32 = arith.constant 0 : i32
    %c0_i32_0 = arith.constant 0 : i32
    %c0_i32_1 = arith.constant 0 : i32
    %c0_i32_2 = arith.constant 0 : i32
    return %c0_i32, %c0_i32_0, %c0_i32_1 : i32, i32, i32
  }
  func.func @transform_14(%arg0: i32) -> i32 {
    %c0_i32 = arith.constant 0 : i32
    %c0_i32_0 = arith.constant 0 : i32
    return %c0_i32 : i32
  }
  func.func @transform_15(%arg0: i32) -> (i32, i32, i32) {
    %c0_i32 = arith.constant 0 : i32
    %c0_i32_0 = arith.constant 0 : i32
    %c0_i32_1 = arith.constant 0 : i32
    return %arg0, %c0_i32, %c0_i32_0 : i32, i32, i32
  }
}

</mosaic_0001>

<bundles_post_ra>
// kernel: social_stgcnn_forward.1
= control target key start
LH: loop header
LB: loop body
LE: loop exit
PB: predicated region body
PF: predicated region fallthrough
CT: control target
= control target key end

     0   :  { %20 = vsyncpa [#allocation3], 0  ;;  %s5724_s0 = inlined_call_operand.vmem [shape: f32[1,16,128], index: 0, kind: input, shape index: {}]   ;;  %s5725_s1 = inlined_call_operand.vmem [shape: f32[8,128,128], index: 1, kind: input, shape index: {}]   ;;  %s5726_s2 = inlined_call_operand.vmem [shape: f32[64,16], index: 2, kind: input, shape index: {}]   ;;  %s5727_s3 = inlined_call_operand.vmem [shape: f32[64,1], index: 3, kind: input, shape index: {}]   ;;  %s5728_s4 = inlined_call_operand.vmem [shape: f32[64,1], index: 4, kind: input, shape index: {}]   ;;  %s5729_s5 = inlined_call_operand.vmem [shape: f32[40,64], index: 5, kind: input, shape index: {}]   ;;  %s5730_s6 = inlined_call_operand.vmem [shape: f32[40,1], index: 6, kind: input, shape index: {}]   ;;  %s5731_s7 = inlined_call_operand.vmem [shape: f32[40,16], index: 7, kind: input, shape index: {}]   ;;  %s5732_s8 = inlined_call_operand.vmem [shape: f32[40,1], index: 8, kind: input, shape index: {}]   ;;  %s5733_s9 = inlined_call_operand.vmem [shape: f32[3,64,40], index: 9, kind: input, shape index: {}]   ;;  %s5734_s10 = inlined_call_operand.vmem [shape: f32[64,1], index: 10, kind: input, shape index: {}]   ;;  %s5735_s11 = inlined_call_operand.vmem [shape: f32[3,64,64], index: 11, kind: input, shape index: {}]   ;;  %s5736_s12 = inlined_call_operand.vmem [shape: f32[64,1], index: 12, kind: input, shape index: {}]   ;;  %s5737_s13 = inlined_call_operand.vmem [shape: f32[2,128,128], index: 13, kind: input, shape index: {}]   ;;  %s5738_s14 = inlined_call_operand.vmem [shape: f32[3], index: 14, kind: input, shape index: {}]   ;;  %s5739_s15 = inlined_call_operand.vmem [shape: f32[1,60,128], index: 15, kind: output, shape index: {}]  }
   0x1   :  { %s55_s20 = sshll.u32 %s5738_s14, 4  ;;  %s56_s20 = int_to_ptr.vmem [resolvable:$true] %s55_s20 }
   0x2   :  { %s4451_s21 = scalar_lea.vmem %s56_s20, 16  ;;  %p4456_p1 = scmp.lt.s32.totalorder %s56_s20, %s56_s20 }
   0x3   :  { %p4452_p0 = scmp.ne.s32.totalorder %s56_s20, %s4451_s21  ;;  %p4457_p2 = scmp.lt.s32.totalorder %s4451_s21, %s4451_s21 }
   0x5   :  { %p4458_p3 = por %p4457_p2, %p4456_p1 }
   0x7   :  { %p4459_p4 = pnand %p4458_p3, %p4452_p0 }
   0x9   :  { %4462 = shalt.err (!%p4459_p4)
}
   0xa   :  { %s4465_s22 = smov [#allocation2]  }
   0xb   :  { %58 = dma.vmem_to_smem %s56_s20, 16, %s4465_s22, [#allocation3]  }
   0xc   :  { %4463 = dma.done.wait [#allocation3], 16  }
   0xd   :  { %4464 = vsyncadd [#allocation3], 4294967280 }
   0xe   :  { %62 = sfence }
   0xf   :  { %v63_v0 = vld [vmem:[%s5724_s0] sm:$0xff]  ;;  %v64_v1 = vld [vmem:[%s5724_s0 + $0x8] sm:$0xff]  ;;  %vm121_vm0 = vcmask 130048   ;;  %v4466_v4 = vmov 0   ;;  %v67_v8 = vld [vmem:[%s5726_s2 + $0x10] sm:$0xff]  ;;  %v4467_v42 = vmov 0.0|0.0  }
  0x10   :  { %v65_v2 = vld [vmem:[%s5726_s2] sm:$0xff]  ;;  %v4562_v3 = vpack.c.bf16 %v64_v1, %v63_v0  ;;  %4449 = vset.pattern.permute.xlu0 %v4466_v4  ;;  %4450 = vset.pattern.permute.xlu1 %v4466_v4  ;;  %v74_v6 = vld [vmem:[%s5727_s3 + $0x8] sm:$0xff]  ;;  %v75_v9 = vld [vmem:[%s5727_s3 + $0x10] sm:$0xff]  ;;  %vm4468_vm1 = vmmov 0   ;;  %vm1065_vm10 = vcmask 523264   ;;  %s2868_s14 = sld [smem:[#allocation2 + $0x1]] }
  0x11   :  { %3323 = vmatprep.mubr.msk.f32.mxu0 %vm121_vm0, %v65_v2  ;;  %v73_v5 = vld [vmem:[%s5727_s3] sm:$0xff]  ;;  %v66_v7 = vld [vmem:[%s5726_s2 + $0x8] sm:$0xff]  ;;  %93 = vperm.xlu1 %4450, %v75_v9   ;;  %v68_v11 = vld [vmem:[%s5726_s2 + $0x18] sm:$0xff] }
  0x12   :  { %83 = vperm.xlu0 %4449, %v73_v5   ;;  %3998 = vmatprep.subr.bf16.mxu0 %v4562_v3  ;;  %v77_v10 = vld [vmem:[%s5727_s3 + $0x20] sm:$0xff]  ;;  %v76_v12 = vld [vmem:[%s5727_s3 + $0x18] sm:$0xff]  ;;  %v79_v14 = vld [vmem:[%s5727_s3 + $0x30] sm:$0xff] }
  0x13   :  { %4000 = vmatpush3.bf16.msra.mxu0 %v4562_v3  ;;  %v69_v13 = vld [vmem:[%s5726_s2 + $0x20] sm:$0xff]  ;;  %v70_v15 = vld [vmem:[%s5726_s2 + $0x28] sm:$0xff]  ;;  %v71_v17 = vld [vmem:[%s5726_s2 + $0x30] sm:$0xff]  ;;  %4001 = vmatprep.subr.bf16.mxu1 %v4467_v42 }
  0x14   :  { %v78_v16 = vld [vmem:[%s5727_s3 + $0x28] sm:$0xff]  ;;  %v949_v18 = vld [vmem:[%s5728_s4] sm:$0xff]  ;;  %v72_v19 = vld [vmem:[%s5726_s2 + $0x38] sm:$0xff]  ;;  %4025 = vmatprep.subr.bf16.mxu0 %v4467_v42 }
  0x15   :  { %98 = vperm.xlu1 %4450, %v76_v12   ;;  %v80_v20 = vld [vmem:[%s5727_s3 + $0x38] sm:$0xff]  ;;  %v951_v21 = vld [vmem:[%s5728_s4 + $0x10] sm:$0xff]  ;;  %v950_v22 = vld [vmem:[%s5728_s4 + $0x8] sm:$0xff] }
  0x16   :  { %88 = vperm.xlu0 %4449, %v74_v6   ;;  %3324 = vmatmul.mubr.msk.f32.vlgmr.msra.gmra.mrb[0].mxu0 %vm121_vm0, %v66_v7  ;;  %v953_v23 = vld [vmem:[%s5728_s4 + $0x20] sm:$0xff]  ;;  %v952_v24 = vld [vmem:[%s5728_s4 + $0x18] sm:$0xff]  ;;  %v955_v25 = vld [vmem:[%s5728_s4 + $0x30] sm:$0xff] }
  0x17   :  { %3326 = vmatprep.mubr.msk.f32.mxu0 %vm121_vm0, %v67_v8  ;;  %v954_v26 = vld [vmem:[%s5728_s4 + $0x28] sm:$0xff]  ;;  %v1035_v27 = vld [vmem:[%s5730_s6] sm:$0xff]  ;;  %v956_v28 = vld [vmem:[%s5728_s4 + $0x38] sm:$0xff] }
  0x18   :  { %v1036_v29 = vld [vmem:[%s5730_s6 + $0x8] sm:$0xff]  ;;  %v1176_v30 = vld [vmem:[%s5732_s8] sm:$0xff]  ;;  %v1037_v31 = vld [vmem:[%s5730_s6 + $0x10] sm:$0xff] }
  0x19   :  { %108 = vperm.xlu1 %4450, %v78_v16   ;;  %v1177_v32 = vld [vmem:[%s5732_s8 + $0x8] sm:$0xff]  ;;  %v1038_v33 = vld [vmem:[%s5730_s6 + $0x18] sm:$0xff]  ;;  %v1178_v34 = vld [vmem:[%s5732_s8 + $0x10] sm:$0xff] }
  0x1a   :  { %103 = vperm.xlu0 %4449, %v77_v10   ;;  %3327 = vmatmul.mubr.msk.f32.gmra.mrb[2].mxu0 %vm121_vm0, %v68_v11  ;;  %v1039_v35 = vld [vmem:[%s5730_s6 + $0x20] sm:$0xff]  ;;  %v1179_v36 = vld [vmem:[%s5732_s8 + $0x18] sm:$0xff]  ;;  %v2757_v40 = vld [vmem:[%s5725_s1 + $0x88] sm:$0xff] }
  0x1b   :  { %3329 = vmatprep.mubr.msk.f32.mxu0 %vm121_vm0, %v69_v13  ;;  %v1967_v37 = vld [vmem:[%s5734_s10] sm:$0xff]  ;;  %v252_v44 = vld [vmem:[%s5725_s1 + $0x8] sm:$0xff]  ;;  %v1969_v45 = vld [vmem:[%s5734_s10 + $0x10] sm:$0xff] }
  0x1c   :  { %v1180_v38 = vld [vmem:[%s5732_s8 + $0x20] sm:$0xff]  ;;  %v1968_v47 = vld [vmem:[%s5734_s10 + $0x8] sm:$0xff]  ;;  %v2758_v48 = vld [vmem:[%s5725_s1 + $0x90] sm:$0xff] }
  0x1d   :  { %118 = vperm.xlu1 %4450, %v80_v20   ;;  %v2756_v39 = vld [vmem:[%s5725_s1 + $0x80] sm:$0xff]  ;;  %v2759_v49 = vld [vmem:[%s5725_s1 + $0x98] sm:$0xff]  ;;  %v253_v50 = vld [vmem:[%s5725_s1 + $0x10] sm:$0xff] }
  0x1e   :  { %113 = vperm.xlu0 %4449, %v79_v14   ;;  %3330 = vmatmul.mubr.msk.f32.gmra.mrb[4].mxu0 %vm121_vm0, %v70_v15  ;;  %v251_v41 = vld [vmem:[%s5725_s1] sm:$0xff]  ;;  %v4026_v43 = vpack.c.bf16 %v2757_v40, %v2756_v39  ;;  %v4029_v51 = vpack.c.bf16 %v2759_v49, %v2758_v48  ;;  %v254_v52 = vld [vmem:[%s5725_s1 + $0x18] sm:$0xff]  ;;  %v2761_v57 = vld [vmem:[%s5725_s1 + $0xa8] sm:$0xff]  ;;  %v4469_v40 = vmov 0.0  }
  0x1f   :  { %3332 = vmatprep.mubr.msk.f32.mxu0 %vm121_vm0, %v71_v17  ;;  %v4002_v46 = vpack.c.bf16 %v252_v44, %v251_v41  ;;  %v1971_v53 = vld [vmem:[%s5734_s10 + $0x20] sm:$0xff]  ;;  %v4005_v54 = vpack.c.bf16 %v254_v52, %v253_v50  ;;  %v1970_v55 = vld [vmem:[%s5734_s10 + $0x18] sm:$0xff]  ;;  %v256_v60 = vld [vmem:[%s5725_s1 + $0x28] sm:$0xff]  ;;  %3367 = vmatprep.mubr.msk.f32.mxu1 %vm4468_vm1, %v4469_v40 }
  0x20   :  { %4027 = vmatpush3.bf16.msra.mxu0 %v4026_v43  ;;  %v2760_v56 = vld [vmem:[%s5725_s1 + $0xa0] sm:$0xff]  ;;  %v1973_v61 = vld [vmem:[%s5734_s10 + $0x30] sm:$0xff]  ;;  %v1972_v63 = vld [vmem:[%s5734_s10 + $0x28] sm:$0xff] }
  0x21   :  { %964 = vperm.xlu1 %4450, %v950_v22   ;;  %4003 = vmatpush3.bf16.msra.mxu1 %v4002_v46  ;;  %v255_v58 = vld [vmem:[%s5725_s1 + $0x20] sm:$0xff]  ;;  %v4032_v59 = vpack.c.bf16 %v2761_v57, %v2760_v56  ;;  %v2762_v0 = vld [vmem:[%s5725_s1 + $0xb0] sm:$0xff]  ;;  %v2763_v1 = vld [vmem:[%s5725_s1 + $0xb8] sm:$0xff] }
  0x22   :  { %959 = vperm.xlu0 %4449, %v949_v18   ;;  %3333 = vmatmul.mubr.msk.f32.gmra.mrb[6].mxu0 %vm121_vm0, %v72_v19  ;;  %v4008_v62 = vpack.c.bf16 %v256_v60, %v255_v58  ;;  %v257_v2 = vld [vmem:[%s5725_s1 + $0x30] sm:$0xff]  ;;  %v4035_v4 = vpack.c.bf16 %v2763_v1, %v2762_v0  ;;  %v258_v5 = vld [vmem:[%s5725_s1 + $0x38] sm:$0xff]  ;;  %v2679_v6 = vld [vmem:[%s5736_s12] sm:$0xff] }
  0x23   :  { %4028 = vmatprep.subr.bf16.mxu0 %v4467_v42  ;;  %4004 = vmatprep.subr.bf16.mxu1 %v4467_v42  ;;  %v4011_v7 = vpack.c.bf16 %v258_v5, %v257_v2  ;;  %v1974_v8 = vld [vmem:[%s5734_s10 + $0x38] sm:$0xff]  ;;  %v2764_v9 = vld [vmem:[%s5725_s1 + $0xc0] sm:$0xff]  ;;  %v2765_v10 = vld [vmem:[%s5725_s1 + $0xc8] sm:$0xff] }
  0x24   :  { %4030 = vmatpush3.bf16.msra.mxu0 %v4029_v51  ;;  %v259_v11 = vld [vmem:[%s5725_s1 + $0x40] sm:$0xff]  ;;  %v4038_v12 = vpack.c.bf16 %v2765_v10, %v2764_v9  ;;  %v260_v13 = vld [vmem:[%s5725_s1 + $0x48] sm:$0xff]  ;;  %v2681_v14 = vld [vmem:[%s5736_s12 + $0x10] sm:$0xff]  ;;  %3402 = vmatprep.mubr.msk.f32.mxu0 %vm4468_vm1, %v4469_v40 }
  0x25   :  { %974 = vperm.xlu1 %4450, %v952_v24   ;;  %4006 = vmatpush3.bf16.msra.mxu1 %v4005_v54  ;;  %v4014_v15 = vpack.c.bf16 %v260_v13, %v259_v11  ;;  %v2680_v16 = vld [vmem:[%s5736_s12 + $0x8] sm:$0xff]  ;;  %v2766_v17 = vld [vmem:[%s5725_s1 + $0xd0] sm:$0xff]  ;;  %v2767_v18 = vld [vmem:[%s5725_s1 + $0xd8] sm:$0xff] }
  0x26   :  { %969 = vperm.xlu0 %4449, %v951_v21   ;;  %4031 = vmatprep.subr.bf16.mxu0 %v4467_v42  ;;  %v261_v19 = vld [vmem:[%s5725_s1 + $0x50] sm:$0xff]  ;;  %v4041_v20 = vpack.c.bf16 %v2767_v18, %v2766_v17  ;;  %v262_v21 = vld [vmem:[%s5725_s1 + $0x58] sm:$0xff]  ;;  %v2683_v22 = vld [vmem:[%s5736_s12 + $0x20] sm:$0xff] }
  0x27   :  { %4007 = vmatprep.subr.bf16.mxu1 %v4467_v42  ;;  %v2682_v24 = vld [vmem:[%s5736_s12 + $0x18] sm:$0xff]  ;;  %v2788_v43 = vld [vmem:[%s5725_s1 + $0x180] sm:$0xff]  ;;  %v2789_v44 = vld [vmem:[%s5725_s1 + $0x188] sm:$0xff] }
  0x28   :  { %4033 = vmatpush3.bf16.msra.mxu0 %v4032_v59  ;;  %v2773_v46 = vld [vmem:[%s5725_s1 + $0x108] sm:$0xff]  ;;  %v4074_v49 = vpack.c.bf16 %v2789_v44, %v2788_v43  ;;  %v2791_v54 = vld [vmem:[%s5725_s1 + $0x198] sm:$0xff]  ;;  %v2774_v56 = vld [vmem:[%s5725_s1 + $0x110] sm:$0xff] }
  0x29   :  { %984 = vperm.xlu1 %4450, %v954_v26   ;;  %4009 = vmatpush3.bf16.msra.mxu1 %v4008_v62  ;;  %v2769_v26 = vld [vmem:[%s5725_s1 + $0xe8] sm:$0xff]  ;;  %v2775_v57 = vld [vmem:[%s5725_s1 + $0x118] sm:$0xff]  ;;  %v2792_v62 = vld [vmem:[%s5725_s1 + $0x1a0] sm:$0xff] }
  0x2a   :  { %979 = vperm.xlu0 %4449, %v953_v23   ;;  %4034 = vmatprep.subr.bf16.mxu0 %v4467_v42  ;;  %v4017_v23 = vpack.c.bf16 %v262_v21, %v261_v19  ;;  %v2776_v0 = vld [vmem:[%s5725_s1 + $0x120] sm:$0xff]  ;;  %v2777_v1 = vld [vmem:[%s5725_s1 + $0x128] sm:$0xff]  ;;  %v2778_v9 = vld [vmem:[%s5725_s1 + $0x130] sm:$0xff] }
  0x2b   :  { %4010 = vmatprep.subr.bf16.mxu1 %v4467_v42  ;;  %v2779_v10 = vld [vmem:[%s5725_s1 + $0x138] sm:$0xff]  ;;  %v2780_v17 = vld [vmem:[%s5725_s1 + $0x140] sm:$0xff]  ;;  %v2781_v18 = vld [vmem:[%s5725_s1 + $0x148] sm:$0xff] }
  0x2c   :  { %4036 = vmatpush3.bf16.msra.mxu0 %v4035_v4  ;;  %v2798_v21 = vld [vmem:[%s5725_s1 + $0x1d0] sm:$0xff]  ;;  %v2821_v43 = vld [vmem:[%s5725_s1 + $0x288] sm:$0xff]  ;;  %v2804_v44 = vld [vmem:[%s5725_s1 + $0x200] sm:$0xff] }
  0x2d   :  { %994 = vperm.xlu1 %4450, %v956_v28   ;;  %4012 = vmatpush3.bf16.msra.mxu1 %v4011_v7  ;;  %v2794_v7 = vld [vmem:[%s5725_s1 + $0x1b0] sm:$0xff] }
  0x2e   :  { %989 = vperm.xlu0 %4449, %v955_v25   ;;  %4037 = vmatprep.subr.bf16.mxu0 %v4467_v42  ;;  %v2768_v25 = vld [vmem:[%s5725_s1 + $0xe0] sm:$0xff] }
  0x2f   :  { %4013 = vmatprep.subr.bf16.mxu1 %v4467_v42  ;;  %v4044_v28 = vpack.c.bf16 %v2769_v26, %v2768_v25 }
  0x30   :  { %4039 = vmatpush3.bf16.msra.mxu0 %v4038_v12 }
  0x31   :  { %1183 = vperm.xlu1 %4450, %v1176_v30   ;;  %4015 = vmatpush3.bf16.msra.mxu1 %v4014_v15  ;;  %v2685_v30 = vld [vmem:[%s5736_s12 + $0x30] sm:$0xff]  ;;  %v2796_v15 = vld [vmem:[%s5725_s1 + $0x1c0] sm:$0xff] }
  0x32   :  { %1042 = vperm.xlu0 %4449, %v1035_v27   ;;  %4040 = vmatprep.subr.bf16.mxu0 %v4467_v42  ;;  %v263_v27 = vld [vmem:[%s5725_s1 + $0x60] sm:$0xff] }
  0x33   :  { %4016 = vmatprep.subr.bf16.mxu1 %v4467_v42 }
  0x34   :  { %4042 = vmatpush3.bf16.msra.mxu0 %v4041_v20  ;;  %v4062_v20 = vpack.c.bf16 %v2781_v18, %v2780_v17  ;;  %v2831_v17 = vld [vmem:[%s5725_s1 + $0x2d8] sm:$0xff]  ;;  %v2814_v18 = vld [vmem:[%s5725_s1 + $0x250] sm:$0xff] }
  0x35   :  { %1188 = vperm.xlu1 %4450, %v1177_v32   ;;  %4018 = vmatpush3.bf16.msra.mxu1 %v4017_v23  ;;  %v2684_v32 = vld [vmem:[%s5736_s12 + $0x28] sm:$0xff]  ;;  %v2782_v23 = vld [vmem:[%s5725_s1 + $0x150] sm:$0xff] }
  0x36   :  { %1047 = vperm.xlu0 %4449, %v1036_v29   ;;  %4043 = vmatprep.subr.bf16.mxu0 %v4467_v42  ;;  %v264_v29 = vld [vmem:[%s5725_s1 + $0x68] sm:$0xff] }
  0x37   :  { %4019 = vmatprep.subr.bf16.mxu1 %v4467_v42 }
  0x38   :  { %4045 = vmatpush3.bf16.msra.mxu0 %v4044_v28  ;;  %v2801_v28 = vld [vmem:[%s5725_s1 + $0x1e8] sm:$0xff] }
  0x39   :  { %1193 = vperm.xlu1 %4450, %v1178_v34   ;;  %4046 = vmatprep.subr.bf16.mxu0 %v4467_v42  ;;  %v2771_v34 = vld [vmem:[%s5725_s1 + $0xf8] sm:$0xff] }
  0x3a   :  { %1052 = vperm.xlu0 %4449, %v1037_v31   ;;  %v4020_v31 = vpack.c.bf16 %v264_v29, %v263_v27  ;;  %v2800_v27 = vld [vmem:[%s5725_s1 + $0x1e0] sm:$0xff] }
  0x3b   :  { %v2784_v29 = vld [vmem:[%s5725_s1 + $0x160] sm:$0xff] }
  0x3c   :  { %4021 = vmatpush3.bf16.msra.mxu1 %v4020_v31  ;;  %v4092_v31 = vpack.c.bf16 %v2801_v28, %v2800_v27  ;;  %v2834_v28 = vld [vmem:[%s5725_s1 + $0x2f0] sm:$0xff] }
  0x3d   :  { %1198 = vperm.xlu1 %4450, %v1179_v36   ;;  %4022 = vmatprep.subr.bf16.mxu1 %v4467_v42  ;;  %v2686_v36 = vld [vmem:[%s5736_s12 + $0x38] sm:$0xff] }
  0x3e   :  { %1057 = vperm.xlu0 %4449, %v1038_v33   ;;  %v2770_v33 = vld [vmem:[%s5725_s1 + $0xf0] sm:$0xff] }
  0x41   :  { %1203 = vperm.xlu1 %4450, %v1180_v38   ;;  %v266_v38 = vld [vmem:[%s5725_s1 + $0x78] sm:$0xff] }
  0x42   :  { %1062 = vperm.xlu0 %4449, %v1039_v35   ;;  %v4047_v35 = vpack.c.bf16 %v2771_v34, %v2770_v33  ;;  %v2802_v33 = vld [vmem:[%s5725_s1 + $0x1f0] sm:$0xff]  ;;  %v2803_v34 = vld [vmem:[%s5725_s1 + $0x1f8] sm:$0xff] }
  0x44   :  { %4048 = vmatpush3.bf16.msra.mxu0 %v4047_v35 }
  0x45   :  { %1982 = vperm.xlu1 %4450, %v1968_v47   ;;  %4073 = vmatprep.subr.bf16.mxu0 %v4467_v42 }
  0x46   :  { %1977 = vperm.xlu0 %4449, %v1967_v37   ;;  %v265_v37 = vld [vmem:[%s5725_s1 + $0x70] sm:$0xff] }
  0x47   :  { %v4023_v39 = vpack.c.bf16 %v266_v38, %v265_v37  ;;  %v2787_v37 = vld [vmem:[%s5725_s1 + $0x178] sm:$0xff]  ;;  %v4095_v38 = vpack.c.bf16 %v2803_v34, %v2802_v33  ;;  %v2852_v34 = vld [vmem:[%s5725_s1 + $0x380] sm:$0xff] }
  0x49   :  { %1992 = vperm.xlu1 %4450, %v1970_v55   ;;  %4024 = vmatpush3.bf16.msra.mxu1 %v4023_v39 }
  0x4a   :  { %1987 = vperm.xlu0 %4449, %v1969_v45   ;;  %4049 = vmatprep.subr.bf16.mxu1 %v4467_v42  ;;  %v2772_v45 = vld [vmem:[%s5725_s1 + $0x100] sm:$0xff] }
  0x4b   :  { %v4050_v52 = vpack.c.bf16 %v2773_v46, %v2772_v45  ;;  %v2805_v45 = vld [vmem:[%s5725_s1 + $0x208] sm:$0xff] }
  0x4d   :  { %2002 = vperm.xlu1 %4450, %v1972_v63   ;;  %v2793_v63 = vld [vmem:[%s5725_s1 + $0x1a8] sm:$0xff] }
  0x4e   :  { %1997 = vperm.xlu0 %4449, %v1971_v53   ;;  %v2790_v53 = vld [vmem:[%s5725_s1 + $0x190] sm:$0xff]  ;;  %v4080_v4 = vpack.c.bf16 %v2793_v63, %v2792_v62 }
  0x4f   :  { %v4077_v59 = vpack.c.bf16 %v2791_v54, %v2790_v53  ;;  %v2806_v53 = vld [vmem:[%s5725_s1 + $0x210] sm:$0xff]  ;;  %v2807_v54 = vld [vmem:[%s5725_s1 + $0x218] sm:$0xff] }
  0x50   :  { %v2826_v63 = vld [vmem:[%s5725_s1 + $0x2b0] sm:$0xff] }
  0x51   :  { %2012 = vperm.xlu1 %4450, %v1974_v8   ;;  %v2795_v8 = vld [vmem:[%s5725_s1 + $0x1b8] sm:$0xff] }
  0x52   :  { %2007 = vperm.xlu0 %4449, %v1973_v61   ;;  %v4053_v61 = vpack.c.bf16 %v2775_v57, %v2774_v56  ;;  %v4083_v12 = vpack.c.bf16 %v2795_v8, %v2794_v7  ;;  %v4101_v56 = vpack.c.bf16 %v2807_v54, %v2806_v53  ;;  %v2824_v57 = vld [vmem:[%s5725_s1 + $0x2a0] sm:$0xff]  ;;  %v2841_v53 = vld [vmem:[%s5725_s1 + $0x328] sm:$0xff] }
  0x53   :  { %v2828_v8 = vld [vmem:[%s5725_s1 + $0x2c0] sm:$0xff] }
  0x55   :  { %2694 = vperm.xlu1 %4450, %v2680_v16   ;;  %v2797_v16 = vld [vmem:[%s5725_s1 + $0x1c8] sm:$0xff] }
  0x56   :  { %2689 = vperm.xlu0 %4449, %v2679_v6   ;;  %v4056_v6 = vpack.c.bf16 %v2777_v1, %v2776_v0  ;;  %v4086_v19 = vpack.c.bf16 %v2797_v16, %v2796_v15  ;;  %v2827_v0 = vld [vmem:[%s5725_s1 + $0x2b8] sm:$0xff]  ;;  %v2810_v1 = vld [vmem:[%s5725_s1 + $0x230] sm:$0xff] }
  0x57   :  { %v2830_v16 = vld [vmem:[%s5725_s1 + $0x2d0] sm:$0xff] }
  0x59   :  { %2704 = vperm.xlu1 %4450, %v2682_v24   ;;  %v2783_v24 = vld [vmem:[%s5725_s1 + $0x158] sm:$0xff] }
  0x5a   :  { %2699 = vperm.xlu0 %4449, %v2681_v14   ;;  %v4059_v14 = vpack.c.bf16 %v2779_v10, %v2778_v9  ;;  %v4065_v26 = vpack.c.bf16 %v2783_v24, %v2782_v23  ;;  %v2829_v9 = vld [vmem:[%s5725_s1 + $0x2c8] sm:$0xff]  ;;  %v2812_v10 = vld [vmem:[%s5725_s1 + $0x240] sm:$0xff] }
  0x5b   :  { %v2833_v23 = vld [vmem:[%s5725_s1 + $0x2e8] sm:$0xff]  ;;  %v2816_v24 = vld [vmem:[%s5725_s1 + $0x260] sm:$0xff] }
  0x5d   :  { %2714 = vperm.xlu1 %4450, %v2684_v32  }
  0x5e   :  { %2709 = vperm.xlu0 %4449, %v2683_v22   ;;  %v2799_v22 = vld [vmem:[%s5725_s1 + $0x1d8] sm:$0xff] }
  0x5f   :  { %v4089_v25 = vpack.c.bf16 %v2799_v22, %v2798_v21  ;;  %v2832_v22 = vld [vmem:[%s5725_s1 + $0x2e0] sm:$0xff] }
  0x61   :  { %2724 = vperm.xlu1 %4450, %v2686_v36   ;;  %v2786_v36 = vld [vmem:[%s5725_s1 + $0x170] sm:$0xff] }
  0x62   :  { %2719 = vperm.xlu0 %4449, %v2685_v30   ;;  %v2785_v30 = vld [vmem:[%s5725_s1 + $0x168] sm:$0xff]  ;;  %v4071_v39 = vpack.c.bf16 %v2787_v37, %v2786_v36  ;;  %v2836_v36 = vld [vmem:[%s5725_s1 + $0x300] sm:$0xff] }
  0x63   :  { %v4068_v32 = vpack.c.bf16 %v2785_v30, %v2784_v29  ;;  %v2835_v29 = vld [vmem:[%s5725_s1 + $0x2f8] sm:$0xff]  ;;  %v2818_v30 = vld [vmem:[%s5725_s1 + $0x270] sm:$0xff]  ;;  %v2837_v37 = vld [vmem:[%s5725_s1 + $0x308] sm:$0xff] }
  0x90   :  { %v94_v35 = vpop.permute.xlu1 %93 }
  0x91   :  { %v84_v41 = vpop.permute.xlu0 %83 }
  0x94   :  { %v99_v46 = vpop.permute.xlu1 %98 }
  0x95   :  { %v89_v47 = vpop.permute.xlu0 %88 }
  0xe9   :  { %v3325_v48 = vpop.f32.mrb[0].mxu0 }
  0xea   :  { %v218_v50 = vadd.f32 %v3325_v48, %v89_v47  ;;  %v212_v51 = vpop.f32.mrb[1].mxu0 }
  0xeb   :  { %v213_v55 = vadd.f32 %v212_v51, %v84_v41  ;;  %v2820_v41 = vld [vmem:[%s5725_s1 + $0x280] sm:$0xff]  ;;  %v2823_v51 = vld [vmem:[%s5725_s1 + $0x298] sm:$0xff] }
  0xec   :  { %3403 = vmatmul.mubr.f32.vlgmr.msra.gmra.mrb[8].mxu0 %v218_v50  ;;  %v4122_v47 = vpack.c.bf16 %v2821_v43, %v2820_v41  ;;  %v2822_v50 = vld [vmem:[%s5725_s1 + $0x290] sm:$0xff]  ;;  %v104_v41 = vpop.permute.xlu0 %103 }
  0xed   :  { %4075 = vmatpush3.bf16.msra.mxu0 %v4074_v49  ;;  %3368 = vmatmul.mubr.f32.vlgmr.msra.gmra.mrb[0].mxu1 %v213_v55  ;;  %v4863_v58 = vpop.f32.mrb[2].mxu0  ;;  %v4098_v49 = vpack.c.bf16 %v2805_v45, %v2804_v44  ;;  %v4125_v55 = vpack.c.bf16 %v2823_v51, %v2822_v50  ;;  %v4146_v44 = vpack.c.bf16 %v2837_v37, %v2836_v36  ;;  %v2854_v45 = vld [vmem:[%s5725_s1 + $0x390] sm:$0xff]  ;;  %v2857_v51 = vld [vmem:[%s5725_s1 + $0x3a8] sm:$0xff] }
  0xee   :  { %4051 = vmatpush3.bf16.msra.mxu1 %v4050_v52  ;;  %4076 = vmatprep.subr.bf16.mxu0 %v4467_v42  ;;  %v4866_v60 = vpop.f32.mrb[3].mxu0  ;;  %v228_v48 = vadd.f32 %v4863_v58, %v99_v46  ;;  %v2825_v58 = vld [vmem:[%s5725_s1 + $0x2a8] sm:$0xff]  ;;  %v2855_v46 = vld [vmem:[%s5725_s1 + $0x398] sm:$0xff] }
  0xef   :  { %4052 = vmatprep.subr.bf16.mxu1 %v4467_v42  ;;  %3472 = vmatprep.mubr.msk.f32.mxu0 %vm4468_vm1, %v4469_v40  ;;  %v223_v52 = vadd.f32 %v4866_v60, %v94_v35  ;;  %v2809_v60 = vld [vmem:[%s5725_s1 + $0x228] sm:$0xff] }
  0xf0   :  { %3437 = vmatprep.mubr.msk.f32.mxu1 %vm4468_vm1, %v4469_v40  ;;  %v2853_v35 = vld [vmem:[%s5725_s1 + $0x388] sm:$0xff] }
  0xf1   :  { %4078 = vmatpush3.bf16.msra.mxu0 %v4077_v59  ;;  %v4885_v2 = vpop.f32.mrb[4].mxu0  ;;  %v2808_v59 = vld [vmem:[%s5725_s1 + $0x220] sm:$0xff] }
  0xf2   :  { %4054 = vmatpush3.bf16.msra.mxu1 %v4053_v61  ;;  %v4887_v5 = vpop.f32.mrb[5].mxu0  ;;  %4079 = vmatprep.subr.bf16.mxu0 %v4467_v42  ;;  %v4128_v61 = vpack.c.bf16 %v2825_v58, %v2824_v57  ;;  %v4104_v62 = vpack.c.bf16 %v2809_v60, %v2808_v59  ;;  %v2859_v57 = vld [vmem:[%s5725_s1 + $0x3b8] sm:$0xff]  ;;  %v2842_v58 = vld [vmem:[%s5725_s1 + $0x330] sm:$0xff] }
  0xf3   :  { %4055 = vmatprep.subr.bf16.mxu1 %v4467_v42  ;;  %v2843_v59 = vld [vmem:[%s5725_s1 + $0x338] sm:$0xff] }
  0xf5   :  { %4081 = vmatpush3.bf16.msra.mxu0 %v4080_v4  ;;  %v4903_v11 = vpop.f32.mrb[6].mxu0  ;;  %v2811_v4 = vld [vmem:[%s5725_s1 + $0x238] sm:$0xff] }
  0xf6   :  { %4057 = vmatpush3.bf16.msra.mxu1 %v4056_v6  ;;  %v4905_v13 = vpop.f32.mrb[7].mxu0  ;;  %4082 = vmatprep.subr.bf16.mxu0 %v4467_v42  ;;  %v4131_v6 = vpack.c.bf16 %v2827_v0, %v2826_v63  ;;  %v4107_v7 = vpack.c.bf16 %v2811_v4, %v2810_v1  ;;  %v2861_v63 = vld [vmem:[%s5725_s1 + $0x3c8] sm:$0xff]  ;;  %v2844_v0 = vld [vmem:[%s5725_s1 + $0x340] sm:$0xff] }
  0xf7   :  { %4058 = vmatprep.subr.bf16.mxu1 %v4467_v42  ;;  %v2845_v1 = vld [vmem:[%s5725_s1 + $0x348] sm:$0xff] }
  0xf9   :  { %4084 = vmatpush3.bf16.msra.mxu0 %v4083_v12  ;;  %v2813_v12 = vld [vmem:[%s5725_s1 + $0x248] sm:$0xff] }
  0xfa   :  { %4060 = vmatpush3.bf16.msra.mxu1 %v4059_v14  ;;  %4085 = vmatprep.subr.bf16.mxu0 %v4467_v42  ;;  %v4134_v14 = vpack.c.bf16 %v2829_v9, %v2828_v8  ;;  %v4110_v15 = vpack.c.bf16 %v2813_v12, %v2812_v10  ;;  %v2863_v8 = vld [vmem:[%s5725_s1 + $0x3d8] sm:$0xff]  ;;  %v2846_v9 = vld [vmem:[%s5725_s1 + $0x350] sm:$0xff] }
  0xfb   :  { %4061 = vmatprep.subr.bf16.mxu1 %v4467_v42  ;;  %v2847_v10 = vld [vmem:[%s5725_s1 + $0x358] sm:$0xff] }
  0xfd   :  { %4087 = vmatpush3.bf16.msra.mxu0 %v4086_v19  ;;  %v2815_v19 = vld [vmem:[%s5725_s1 + $0x258] sm:$0xff] }
  0xfe   :  { %4063 = vmatpush3.bf16.msra.mxu1 %v4062_v20  ;;  %4088 = vmatprep.subr.bf16.mxu0 %v4467_v42  ;;  %v4137_v20 = vpack.c.bf16 %v2831_v17, %v2830_v16  ;;  %v4113_v21 = vpack.c.bf16 %v2815_v19, %v2814_v18  ;;  %v2865_v16 = vld [vmem:[%s5725_s1 + $0x3e8] sm:$0xff]  ;;  %v2848_v17 = vld [vmem:[%s5725_s1 + $0x360] sm:$0xff] }
  0xff   :  { %4064 = vmatprep.subr.bf16.mxu1 %v4467_v42  ;;  %v2849_v18 = vld [vmem:[%s5725_s1 + $0x368] sm:$0xff] }
 0x101   :  { %4090 = vmatpush3.bf16.msra.mxu0 %v4089_v25  ;;  %v2817_v25 = vld [vmem:[%s5725_s1 + $0x268] sm:$0xff] }
 0x102   :  { %4066 = vmatpush3.bf16.msra.mxu1 %v4065_v26  ;;  %4091 = vmatprep.subr.bf16.mxu0 %v4467_v42  ;;  %v4140_v26 = vpack.c.bf16 %v2833_v23, %v2832_v22  ;;  %v4116_v27 = vpack.c.bf16 %v2817_v25, %v2816_v24  ;;  %v2867_v22 = vld [vmem:[%s5725_s1 + $0x3f8] sm:$0xff]  ;;  %v2850_v23 = vld [vmem:[%s5725_s1 + $0x370] sm:$0xff] }
 0x103   :  { %4067 = vmatprep.subr.bf16.mxu1 %v4467_v42  ;;  %v2851_v24 = vld [vmem:[%s5725_s1 + $0x378] sm:$0xff] }
 0x105   :  { %4093 = vmatpush3.bf16.msra.mxu0 %v4092_v31  ;;  %v2819_v31 = vld [vmem:[%s5725_s1 + $0x278] sm:$0xff] }
 0x106   :  { %4069 = vmatpush3.bf16.msra.mxu1 %v4068_v32  ;;  %4094 = vmatprep.subr.bf16.mxu0 %v4467_v42  ;;  %v4143_v32 = vpack.c.bf16 %v2835_v29, %v2834_v28  ;;  %v4119_v33 = vpack.c.bf16 %v2819_v31, %v2818_v30  ;;  %v114_v28 = vpop.permute.xlu0 %113 }
 0x107   :  { %4070 = vmatprep.subr.bf16.mxu1 %v4467_v42  ;;  %v243_v30 = vadd.f32 %v4905_v13, %v114_v28 }
 0x109   :  { %4096 = vmatpush3.bf16.msra.mxu0 %v4095_v38  ;;  %v109_v38 = vpop.permute.xlu1 %108 }
 0x10a   :  { %4072 = vmatpush3.bf16.msra.mxu1 %v4071_v39  ;;  %4121 = vmatprep.subr.bf16.mxu0 %v4467_v42  ;;  %v4170_v39 = vpack.c.bf16 %v2853_v35, %v2852_v34  ;;  %v238_v43 = vadd.f32 %v4885_v2, %v109_v38  ;;  %v2838_v2 = vld [vmem:[%s5725_s1 + $0x310] sm:$0xff]  ;;  %v960_v31 = vpop.permute.xlu0 %959 }
 0x10b   :  { %4097 = vmatprep.subr.bf16.mxu1 %v4467_v42 }
 0x10c   :  { %3473 = vmatmul.mubr.f32.vlgmr.msra.gmra.mrb[10].mxu0 %v228_v48  ;;  %v2839_v48 = vld [vmem:[%s5725_s1 + $0x318] sm:$0xff] }
 0x10d   :  { %3438 = vmatmul.mubr.f32.vlgmr.msra.gmra.mrb[2].mxu1 %v223_v52  ;;  %4123 = vmatpush3.bf16.msra.mxu0 %v4122_v47  ;;  %v233_v47 = vadd.f32 %v4887_v5, %v104_v41  ;;  %v4149_v50 = vpack.c.bf16 %v2839_v48, %v2838_v2  ;;  %v2856_v5 = vld [vmem:[%s5725_s1 + $0x3a0] sm:$0xff]  ;;  %v1335_v48 = vld [vmem:[%s5737_s13 + $0x18] sm:$0xff] }
 0x10e   :  { %4099 = vmatpush3.bf16.msra.mxu1 %v4098_v49  ;;  %4124 = vmatprep.subr.bf16.mxu0 %v4467_v42  ;;  %v4173_v49 = vpack.c.bf16 %v2855_v46, %v2854_v45  ;;  %v2840_v52 = vld [vmem:[%s5725_s1 + $0x320] sm:$0xff]  ;;  %v4176_v54 = vpack.c.bf16 %v2857_v51, %v2856_v5  ;;  %v1333_v46 = vld [vmem:[%s5737_s13 + $0x8] sm:$0xff] }
 0x10f   :  { %4100 = vmatprep.subr.bf16.mxu1 %v4467_v42  ;;  %3542 = vmatprep.mubr.msk.f32.mxu0 %vm4468_vm1, %v4469_v40  ;;  %v1332_v45 = vld [vmem:[%s5737_s13] sm:$0xff]  ;;  %v1337_v5 = vld [vmem:[%s5737_s13 + $0x28] sm:$0xff] }
 0x110   :  { %3507 = vmatprep.mubr.msk.f32.mxu1 %vm4468_vm1, %v4469_v40  ;;  %v5223_v2 = vpack.c.bf16 %v1333_v46, %v1332_v45  ;;  %v1030_v45 = vld [vmem:[%s5729_s5] sm:$0xff]  ;;  %v1032_v46 = vld [vmem:[%s5729_s5 + $0x10] sm:$0xff] }
 0x111   :  { %4126 = vmatpush3.bf16.msra.mxu0 %v4125_v55  ;;  %v4152_v55 = vpack.c.bf16 %v2841_v53, %v2840_v52  ;;  %v1338_v52 = vld [vmem:[%s5737_s13 + $0x30] sm:$0xff]  ;;  %v1339_v53 = vld [vmem:[%s5737_s13 + $0x38] sm:$0xff] }
 0x112   :  { %4102 = vmatpush3.bf16.msra.mxu1 %v4101_v56  ;;  %4127 = vmatprep.subr.bf16.mxu0 %v4467_v42  ;;  %v2858_v56 = vld [vmem:[%s5725_s1 + $0x3b0] sm:$0xff] }
 0x113   :  { %4103 = vmatprep.subr.bf16.mxu1 %v4467_v42  ;;  %v4179_v60 = vpack.c.bf16 %v2859_v57, %v2858_v56  ;;  %v1341_v56 = vld [vmem:[%s5737_s13 + $0x48] sm:$0xff]  ;;  %v970_v57 = vpop.permute.xlu0 %969 }
 0x115   :  { %4129 = vmatpush3.bf16.msra.mxu0 %v4128_v61  ;;  %v4155_v61 = vpack.c.bf16 %v2843_v59, %v2842_v58 }
 0x116   :  { %4105 = vmatpush3.bf16.msra.mxu1 %v4104_v62  ;;  %4130 = vmatprep.subr.bf16.mxu0 %v4467_v42  ;;  %v2860_v62 = vld [vmem:[%s5725_s1 + $0x3c0] sm:$0xff] }
 0x117   :  { %4106 = vmatprep.subr.bf16.mxu1 %v4467_v42  ;;  %v4182_v4 = vpack.c.bf16 %v2861_v63, %v2860_v62  ;;  %v1343_v62 = vld [vmem:[%s5737_s13 + $0x58] sm:$0xff] }
 0x119   :  { %4132 = vmatpush3.bf16.msra.mxu0 %v4131_v6  ;;  %v4158_v6 = vpack.c.bf16 %v2845_v1, %v2844_v0 }
 0x11a   :  { %4108 = vmatpush3.bf16.msra.mxu1 %v4107_v7  ;;  %4133 = vmatprep.subr.bf16.mxu0 %v4467_v42  ;;  %v2862_v7 = vld [vmem:[%s5725_s1 + $0x3d0] sm:$0xff] }
 0x11b   :  { %4109 = vmatprep.subr.bf16.mxu1 %v4467_v42  ;;  %v4185_v12 = vpack.c.bf16 %v2863_v8, %v2862_v7 }
 0x11d   :  { %4135 = vmatpush3.bf16.msra.mxu0 %v4134_v14  ;;  %v4161_v14 = vpack.c.bf16 %v2847_v10, %v2846_v9  ;;  %v1344_v10 = vld [vmem:[%s5737_s13 + $0x60] sm:$0xff] }
 0x11e   :  { %4111 = vmatpush3.bf16.msra.mxu1 %v4110_v15  ;;  %4136 = vmatprep.subr.bf16.mxu0 %v4467_v42  ;;  %v2864_v15 = vld [vmem:[%s5725_s1 + $0x3e0] sm:$0xff] }
 0x11f   :  { %4112 = vmatprep.subr.bf16.mxu1 %v4467_v42  ;;  %v4188_v19 = vpack.c.bf16 %v2865_v16, %v2864_v15 }
 0x121   :  { %4138 = vmatpush3.bf16.msra.mxu0 %v4137_v20  ;;  %v4164_v20 = vpack.c.bf16 %v2849_v18, %v2848_v17  ;;  %v980_v18 = vpop.permute.xlu0 %979 }
 0x122   :  { %4114 = vmatpush3.bf16.msra.mxu1 %v4113_v21  ;;  %4139 = vmatprep.subr.bf16.mxu0 %v4467_v42  ;;  %v2866_v21 = vld [vmem:[%s5725_s1 + $0x3f0] sm:$0xff]  ;;  %s946_s1 = sld [smem:[#allocation2]] }
 0x123   :  { %4115 = vmatprep.subr.bf16.mxu1 %v4467_v42  ;;  %v4191_v25 = vpack.c.bf16 %v2867_v22, %v2866_v21 }
 0x125   :  { %4141 = vmatpush3.bf16.msra.mxu0 %v4140_v26  ;;  %v4167_v26 = vpack.c.bf16 %v2851_v24, %v2850_v23 }
 0x126   :  { %4117 = vmatpush3.bf16.msra.mxu1 %v4116_v27  ;;  %4142 = vmatprep.subr.bf16.mxu0 %v4467_v42  ;;  %v119_v27 = vpop.permute.xlu1 %118 }
 0x127   :  { %4118 = vmatprep.subr.bf16.mxu1 %v4467_v42  ;;  %v248_v29 = vadd.f32 %v4903_v11, %v119_v27 }
 0x128   :  { %v5209_v11 = vstv %s946_s1 }
 0x129   :  { %4144 = vmatpush3.bf16.msra.mxu0 %v4143_v32 }
 0x12a   :  { %4120 = vmatpush3.bf16.msra.mxu1 %v4119_v33  ;;  %4169 = vmatprep.subr.bf16.mxu0 %v4467_v42  ;;  %v965_v32 = vpop.permute.xlu1 %964 }
 0x12b   :  { %4145 = vmatprep.subr.bf16.mxu1 %v4467_v42 }
 0x12c   :  { %3543 = vmatmul.mubr.f32.vlgmr.msra.gmra.mrb[12].mxu0 %v238_v43 }
 0x12d   :  { %3508 = vmatmul.mubr.f32.vlgmr.msra.gmra.mrb[4].mxu1 %v233_v47  ;;  %4171 = vmatpush3.bf16.msra.mxu0 %v4170_v39  ;;  %v1334_v47 = vld [vmem:[%s5737_s13 + $0x10] sm:$0xff] }
 0x12e   :  { %4147 = vmatpush3.bf16.msra.mxu1 %v4146_v44  ;;  %4172 = vmatprep.subr.bf16.mxu0 %v4467_v42  ;;  %v975_v59 = vpop.permute.xlu1 %974 }
 0x12f   :  { %4148 = vmatprep.subr.bf16.mxu1 %v4467_v42  ;;  %3612 = vmatprep.mubr.msk.f32.mxu0 %vm4468_vm1, %v4469_v40 }
 0x130   :  { %3577 = vmatprep.mubr.msk.f32.mxu1 %vm4468_vm1, %v4469_v40 }
 0x131   :  { %4174 = vmatpush3.bf16.msra.mxu0 %v4173_v49  ;;  %v5229_v49 = vpack.c.bf16 %v1335_v48, %v1334_v47  ;;  %v1033_v47 = vld [vmem:[%s5729_s5 + $0x18] sm:$0xff]  ;;  %v1171_v48 = vld [vmem:[%s5731_s7] sm:$0xff] }
 0x132   :  { %4150 = vmatpush3.bf16.msra.mxu1 %v4149_v50  ;;  %4175 = vmatprep.subr.bf16.mxu0 %v4467_v42  ;;  %v1336_v50 = vld [vmem:[%s5737_s13 + $0x20] sm:$0xff] }
 0x133   :  { %4151 = vmatprep.subr.bf16.mxu1 %v4467_v42  ;;  %v5239_v51 = vpack.c.bf16 %v1337_v5, %v1336_v50  ;;  %v1172_v50 = vld [vmem:[%s5731_s7 + $0x8] sm:$0xff]  ;;  %v1173_v5 = vld [vmem:[%s5731_s7 + $0x10] sm:$0xff] }
 0x135   :  { %4177 = vmatpush3.bf16.msra.mxu0 %v4176_v54  ;;  %v5249_v54 = vpack.c.bf16 %v1339_v53, %v1338_v52  ;;  %v1174_v52 = vld [vmem:[%s5731_s7 + $0x18] sm:$0xff]  ;;  %v1175_v53 = vld [vmem:[%s5731_s7 + $0x20] sm:$0xff] }
 0x136   :  { %4153 = vmatpush3.bf16.msra.mxu1 %v4152_v55  ;;  %4178 = vmatprep.subr.bf16.mxu0 %v4467_v42  ;;  %v1340_v55 = vld [vmem:[%s5737_s13 + $0x40] sm:$0xff] }
 0x137   :  { %4154 = vmatprep.subr.bf16.mxu1 %v4467_v42  ;;  %v5259_v58 = vpack.c.bf16 %v1341_v56, %v1340_v55  ;;  %v1346_v55 = vld [vmem:[%s5737_s13 + $0x70] sm:$0xff]  ;;  %v1347_v56 = vld [vmem:[%s5737_s13 + $0x78] sm:$0xff] }
 0x139   :  { %4180 = vmatpush3.bf16.msra.mxu0 %v4179_v60 }
 0x13a   :  { %4156 = vmatpush3.bf16.msra.mxu1 %v4155_v61  ;;  %4181 = vmatprep.subr.bf16.mxu0 %v4467_v42  ;;  %v1342_v61 = vld [vmem:[%s5737_s13 + $0x50] sm:$0xff] }
 0x13b   :  { %4157 = vmatprep.subr.bf16.mxu1 %v4467_v42  ;;  %v5270_v8 = vpack.c.bf16 %v1343_v62, %v1342_v61 }
 0x13d   :  { %4183 = vmatpush3.bf16.msra.mxu0 %v4182_v4 }
 0x13e   :  { %4159 = vmatpush3.bf16.msra.mxu1 %v4158_v6  ;;  %4184 = vmatprep.subr.bf16.mxu0 %v4467_v42 }
 0x13f   :  { %4160 = vmatprep.subr.bf16.mxu1 %v4467_v42 }
 0x141   :  { %4186 = vmatpush3.bf16.msra.mxu0 %v4185_v12  ;;  %v1345_v12 = vld [vmem:[%s5737_s13 + $0x68] sm:$0xff] }
 0x142   :  { %4162 = vmatpush3.bf16.msra.mxu1 %v4161_v14  ;;  %4187 = vmatprep.subr.bf16.mxu0 %v4467_v42  ;;  %v5281_v17 = vpack.c.bf16 %v1345_v12, %v1344_v10 }
 0x143   :  { %4163 = vmatprep.subr.bf16.mxu1 %v4467_v42 }
 0x145   :  { %4189 = vmatpush3.bf16.msra.mxu0 %v4188_v19  ;;  %v985_v19 = vpop.permute.xlu1 %984 }
 0x146   :  { %4165 = vmatpush3.bf16.msra.mxu1 %v4164_v20  ;;  %4190 = vmatprep.subr.bf16.mxu0 %v4467_v42 }
 0x147   :  { %4166 = vmatprep.subr.bf16.mxu1 %v4467_v42 }
 0x149   :  { %4192 = vmatpush3.bf16.msra.mxu0 %v4191_v25 }
 0x14a   :  { %4168 = vmatpush3.bf16.msra.mxu1 %v4167_v26  ;;  %4208 = vmatprep.subr.bf16.mxu0 %v4467_v42 }
 0x14b   :  { %4193 = vmatprep.subr.bf16.mxu1 %v4467_v42 }
 0x14c   :  { %3613 = vmatmul.mubr.f32.vlgmr.msra.gmra.mrb[14].mxu0 %v248_v29 }
 0x14d   :  { %3578 = vmatmul.mubr.f32.vlgmr.msra.gmra.mrb[6].mxu1 %v243_v30  ;;  %3697 = vmatprep.mubr.msk.f32.mxu0 %vm4468_vm1, %v4469_v40 }
 0x14e   :  { %3631 = vmatprep.mubr.msk.f32.mxu1 %vm4468_vm1, %v4469_v40  ;;  %4210 = vmatpush3.bf16.msra.mxu0 %v5223_v2 }
 0x14f   :  { %4211 = vmatprep.subr.bf16.mxu0 %v4467_v42 }
 0x152   :  { %4213 = vmatpush3.bf16.msra.mxu0 %v5229_v49 }
 0x153   :  { %4214 = vmatprep.subr.bf16.mxu0 %v4467_v42 }
 0x156   :  { %4216 = vmatpush3.bf16.msra.mxu0 %v5239_v51 }
 0x157   :  { %4217 = vmatprep.subr.bf16.mxu0 %v4467_v42 }
 0x15a   :  { %4219 = vmatpush3.bf16.msra.mxu0 %v5249_v54 }
 0x15b   :  { %4220 = vmatprep.subr.bf16.mxu0 %v4467_v42 }
 0x15e   :  { %4222 = vmatpush3.bf16.msra.mxu0 %v5259_v58 }
 0x15f   :  { %4223 = vmatprep.subr.bf16.mxu0 %v4467_v42 }
 0x162   :  { %4225 = vmatpush3.bf16.msra.mxu0 %v5270_v8 }
 0x163   :  { %4226 = vmatprep.subr.bf16.mxu0 %v4467_v42 }
 0x166   :  { %4228 = vmatpush3.bf16.msra.mxu0 %v5281_v17 }
 0x167   :  { %4229 = vmatprep.subr.bf16.mxu0 %v4467_v42 }
 0x1bf   :  { %v420_v33 = vpop.f32.mrb[8].mxu0 }
 0x1c0   :  { %v998_v34 = vadd.f32 %v965_v32, %v420_v33  ;;  %v333_v35 = vpop.f32.mrb[0].mxu1  ;;  %v3404_v36 = vpop.f32.mrb[9].mxu0 }
 0x1c1   :  { %v997_v13 = vadd.f32 %v960_v31, %v333_v35  ;;  %v3369_v37 = vpop.f32.mrb[1].mxu1  ;;  %v990_v31 = vpop.permute.xlu0 %989 }
 0x1c2   :  { %vm1006_vm2 = vcmp.ge.f32.partialorder %v998_v34, 0.0  ;;  %v1015_v38 = vmul.f32 %v5209_v11, %v998_v34  ;;  %v995_v32 = vpop.permute.xlu1 %994 }
 0x1c3   :  { %vm1005_vm3 = vcmp.ge.f32.partialorder %v997_v13, 0.0  ;;  %v1014_v39 = vmul.f32 %v5209_v11, %v997_v13 }
 0x1c4   :  { %v1023_v41 = vsel %vm1006_vm2, %v998_v34, %v1015_v38 }
 0x1c5   :  { %v1022_v43 = vsel %vm1005_vm3, %v997_v13, %v1014_v39 }
 0x1c6   :  { %v4194_v44 = vpack.c.bf16 %v1023_v41, %v1022_v43 }
 0x1c8   :  { %4195 = vmatpush3.bf16.msra.mxu1 %v4194_v44 }
 0x1c9   :  { %4196 = vmatprep.subr.bf16.mxu1 %v4467_v42 }
 0x1df   :  { %v594_v60 = vpop.f32.mrb[10].mxu0 }
 0x1e0   :  { %v1000_v63 = vadd.f32 %v975_v59, %v594_v60  ;;  %v507_v0 = vpop.f32.mrb[2].mxu1  ;;  %v3474_v1 = vpop.f32.mrb[11].mxu0 }
 0x1e1   :  { %v999_v4 = vadd.f32 %v970_v57, %v507_v0  ;;  %v3439_v6 = vpop.f32.mrb[3].mxu1  ;;  %v5358_v57 = vpack.c.bf16 %v1347_v56, %v1346_v55  ;;  %v1184_v59 = vpop.permute.xlu1 %1183 }
 0x1e2   :  { %vm1008_vm4 = vcmp.ge.f32.partialorder %v1000_v63, 0.0  ;;  %v1017_v7 = vmul.f32 %v5209_v11, %v1000_v63  ;;  %v1043_v60 = vpop.permute.xlu0 %1042  ;;  %v2880_v6 = vld [vmem:[%s5737_s13 + $0x80] sm:$0xff] }
 0x1e3   :  { %vm1007_vm5 = vcmp.ge.f32.partialorder %v999_v4, 0.0  ;;  %v1016_v9 = vmul.f32 %v5209_v11, %v999_v4  ;;  %4231 = vmatpush3.bf16.msra.mxu0 %v5358_v57 }
 0x1e4   :  { %v1025_v14 = vsel %vm1008_vm4, %v1000_v63, %v1017_v7  ;;  %4232 = vmatprep.subr.bf16.mxu0 %v4467_v42  ;;  %v4392_v63 = vadd.f32 %v1184_v59, %v1043_v60  ;;  %v2881_v7 = vld [vmem:[%s5737_s13 + $0x88] sm:$0xff] }
 0x1e5   :  { %v1024_v15 = vsel %vm1007_vm5, %v999_v4, %v1016_v9  ;;  %v1189_v61 = vpop.permute.xlu1 %1188  ;;  %v5362_v4 = vstv %s2868_s14 }
 0x1e6   :  { %v4197_v16 = vpack.c.bf16 %v1025_v14, %v1024_v15  ;;  %v1048_v62 = vpop.permute.xlu0 %1047 }
 0x1e7   :  { %v4394_v14 = vadd.f32 %v1189_v61, %v1048_v62  ;;  %v2890_v62 = vld [vmem:[%s5737_s13 + $0xd0] sm:$0xff] }
 0x1e8   :  { %4198 = vmatpush3.bf16.msra.mxu1 %v4197_v16  ;;  %v5371_v16 = vpack.c.bf16 %v2881_v7, %v2880_v6  ;;  %v2893_v6 = vld [vmem:[%s5737_s13 + $0xe8] sm:$0xff] }
 0x1e9   :  { %4199 = vmatprep.subr.bf16.mxu1 %v4467_v42  ;;  %v1194_v0 = vpop.permute.xlu1 %1193 }
 0x1ea   :  { %v1053_v12 = vpop.permute.xlu0 %1052 }
 0x1ff   :  { %v768_v20 = vpop.f32.mrb[12].mxu0 }
 0x200   :  { %v1002_v21 = vadd.f32 %v985_v19, %v768_v20  ;;  %v681_v22 = vpop.f32.mrb[4].mxu1  ;;  %v3544_v23 = vpop.f32.mrb[13].mxu0  ;;  %v2882_v19 = vld [vmem:[%s5737_s13 + $0x90] sm:$0xff]  ;;  %v2883_v20 = vld [vmem:[%s5737_s13 + $0x98] sm:$0xff] }
 0x201   :  { %v1001_v24 = vadd.f32 %v980_v18, %v681_v22  ;;  %v3509_v25 = vpop.f32.mrb[5].mxu1 }
 0x202   :  { %vm1010_vm6 = vcmp.ge.f32.partialorder %v1002_v21, 0.0  ;;  %v1019_v26 = vmul.f32 %v5209_v11, %v1002_v21  ;;  %v4396_v25 = vadd.f32 %v1194_v0, %v1053_v12 }
 0x203   :  { %vm1009_vm7 = vcmp.ge.f32.partialorder %v1001_v24, 0.0  ;;  %v1018_v27 = vmul.f32 %v5209_v11, %v1001_v24 }
 0x204   :  { %v1027_v28 = vsel %vm1010_vm6, %v1002_v21, %v1019_v26 }
 0x205   :  { %v1026_v29 = vsel %vm1009_vm7, %v1001_v24, %v1018_v27  ;;  %v1199_v24 = vpop.permute.xlu1 %1198  ;;  %v5386_v27 = vpack.c.bf16 %v2883_v20, %v2882_v19 }
 0x206   :  { %v4200_v30 = vpack.c.bf16 %v1027_v28, %v1026_v29  ;;  %v1058_v28 = vpop.permute.xlu0 %1057 }
 0x208   :  { %4201 = vmatpush3.bf16.msra.mxu1 %v4200_v30  ;;  %v2884_v30 = vld [vmem:[%s5737_s13 + $0xa0] sm:$0xff] }
 0x209   :  { %4202 = vmatprep.subr.bf16.mxu1 %v4467_v42 }
 0x21f   :  { %v942_v33 = vpop.f32.mrb[14].mxu0 }
 0x220   :  { %v1004_v34 = vadd.f32 %v995_v32, %v942_v33  ;;  %v855_v35 = vpop.f32.mrb[6].mxu1  ;;  %v3614_v36 = vpop.f32.mrb[15].mxu0 }
 0x221   :  { %v1003_v13 = vadd.f32 %v990_v31, %v855_v35  ;;  %v3579_v37 = vpop.f32.mrb[7].mxu1  ;;  %v2885_v31 = vld [vmem:[%s5737_s13 + $0xa8] sm:$0xff]  ;;  %v4398_v36 = vadd.f32 %v1199_v24, %v1058_v28 }
 0x222   :  { %vm1012_vm8 = vcmp.ge.f32.partialorder %v1004_v34, 0.0  ;;  %v1021_v38 = vmul.f32 %v5209_v11, %v1004_v34  ;;  %v5404_v37 = vpack.c.bf16 %v2885_v31, %v2884_v30  ;;  %v1546_v28 = vld [vmem:[%s5733_s9 + $0x8] sm:$0xff]  ;;  %v1548_v30 = vld [vmem:[%s5733_s9 + $0x18] sm:$0xff]  ;;  %v1549_v31 = vld [vmem:[%s5733_s9 + $0x20] sm:$0xff] }
 0x223   :  { %vm1011_vm9 = vcmp.ge.f32.partialorder %v1003_v13, 0.0  ;;  %v1020_v39 = vmul.f32 %v5209_v11, %v1003_v13  ;;  %v1031_v11 = vld [vmem:[%s5729_s5 + $0x8] sm:$0xff] }
 0x224   :  { %v1029_v41 = vsel %vm1012_vm8, %v1004_v34, %v1021_v38  ;;  %v1204_v38 = vpop.permute.xlu1 %1203 }
 0x225   :  { %v1028_v43 = vsel %vm1011_vm9, %v1003_v13, %v1020_v39 }
 0x226   :  { %v4203_v44 = vpack.c.bf16 %v1029_v41, %v1028_v43  ;;  %v2886_v41 = vld [vmem:[%s5737_s13 + $0xb0] sm:$0xff]  ;;  %v2887_v43 = vld [vmem:[%s5737_s13 + $0xb8] sm:$0xff] }
 0x228   :  { %4204 = vmatpush3.bf16.msra.mxu1 %v4203_v44 }
 0x229   :  { %4205 = vmatprep.subr.bf16.mxu1 %v4467_v42 }
 0x22b   :  { %3632 = vmatmul.mubr.msk.f32.vlgmr.msra.gmra.mrb[8].mxu1 %vm1065_vm10, %v1030_v45 }
 0x22c   :  { %3634 = vmatprep.mubr.msk.f32.mxu1 %vm4468_vm1, %v4469_v40  ;;  %4207 = vmatpush3.bf16.msra.mxu1 %v4562_v3  ;;  %v1034_v3 = vld [vmem:[%s5729_s5 + $0x20] sm:$0xff] }
 0x22f   :  { %3635 = vmatmul.mubr.msk.f32.gmra.mrb[10].mxu1 %vm1065_vm10, %v1031_v11 }
 0x230   :  { %3637 = vmatprep.mubr.msk.f32.mxu1 %vm4468_vm1, %v4469_v40 }
 0x233   :  { %3638 = vmatmul.mubr.msk.f32.gmra.mrb[12].mxu1 %vm1065_vm10, %v1032_v46  ;;  %v1063_v46 = vpop.permute.xlu0 %1062 }
 0x234   :  { %3640 = vmatprep.mubr.msk.f32.mxu1 %vm4468_vm1, %v4469_v40 }
 0x237   :  { %3641 = vmatmul.mubr.msk.f32.gmra.mrb[14].mxu1 %vm1065_vm10, %v1033_v47  ;;  %v4400_v47 = vadd.f32 %v1204_v38, %v1063_v46 }
 0x238   :  { %3643 = vmatprep.mubr.msk.f32.mxu1 %vm4468_vm1, %v4469_v40 }
 0x23b   :  { %3644 = vmatmul.mubr.msk.f32.gmra.mrb[16].mxu1 %vm1065_vm10, %v1034_v3 }
 0x23c   :  { %3650 = vmatprep.mubr.msk.f32.mxu1 %vm4468_vm1, %v4469_v40 }
 0x23f   :  { %3651 = vmatmul.mubr.msk.f32.vlgmr.msra.gmra.mrb[8].mxu1 %vm121_vm0, %v1171_v48  ;;  %v5417_v48 = vpack.c.bf16 %v2887_v43, %v2886_v41 }
 0x240   :  { %3653 = vmatprep.mubr.msk.f32.mxu1 %vm4468_vm1, %v4469_v40 }
 0x243   :  { %3654 = vmatmul.mubr.msk.f32.gmra.mrb[10].mxu1 %vm121_vm0, %v1172_v50 }
 0x244   :  { %3656 = vmatprep.mubr.msk.f32.mxu1 %vm4468_vm1, %v4469_v40 }
 0x247   :  { %3657 = vmatmul.mubr.msk.f32.gmra.mrb[12].mxu1 %vm121_vm0, %v1173_v5  ;;  %v2888_v5 = vld [vmem:[%s5737_s13 + $0xc0] sm:$0xff] }
 0x248   :  { %3659 = vmatprep.mubr.msk.f32.mxu1 %vm4468_vm1, %v4469_v40 }
 0x24b   :  { %3660 = vmatmul.mubr.msk.f32.gmra.mrb[14].mxu1 %vm121_vm0, %v1174_v52  ;;  %v2889_v52 = vld [vmem:[%s5737_s13 + $0xc8] sm:$0xff] }
 0x24c   :  { %3662 = vmatprep.mubr.msk.f32.mxu1 %vm4468_vm1, %v4469_v40  ;;  %v5430_v61 = vpack.c.bf16 %v2889_v52, %v2888_v5  ;;  %v2922_v5 = vld [vmem:[%s5733_s9 + $0x90] sm:$0xff]  ;;  %v2923_v52 = vld [vmem:[%s5733_s9 + $0x98] sm:$0xff] }
 0x24f   :  { %3663 = vmatmul.mubr.msk.f32.gmra.mrb[16].mxu1 %vm121_vm0, %v1175_v53  ;;  %vm1562_vm0 = vcmask 326656  }
 0x312   :  { %v1287_v1 = vpop.f32.mrb[8].mxu1 }
 0x313   :  { %v4393_v9 = vadd.f32 %v4392_v63, %v1287_v1  ;;  %v3652_v10 = vpop.f32.mrb[9].mxu1  ;;  %v2891_v63 = vld [vmem:[%s5737_s13 + $0xd8] sm:$0xff] }
 0x314   :  { %v5440_v1 = vpack.c.bf16 %v2891_v63, %v2890_v62  ;;  %v2895_v10 = vld [vmem:[%s5737_s13 + $0xf8] sm:$0xff] }
 0x315   :  { %vm1316_vm11 = vcmp.ge.f32.partialorder %v4393_v9, 0.0  ;;  %v1322_v15 = vmul.f32 %v4393_v9, %v5362_v4 }
 0x316   :  { %v1292_v18 = vpop.f32.mrb[10].mxu1 }
 0x317   :  { %v4395_v21 = vadd.f32 %v4394_v14, %v1292_v18  ;;  %v3655_v22 = vpop.f32.mrb[11].mxu1  ;;  %v5379_v23 = vsel %vm1316_vm11, %v4393_v9, %v1322_v15  ;;  %v2894_v9 = vld [vmem:[%s5737_s13 + $0xf0] sm:$0xff] }
 0x318   :  { %3698 = vmatmul.mubr.f32.vlgmr.msra.gmra.mrb[16].mxu0 %v5379_v23  ;;  %v5462_v12 = vpack.c.bf16 %v2895_v10, %v2894_v9 }
 0x319   :  { %v1323_v26 = vmul.f32 %v4395_v21, %v5362_v4  ;;  %4234 = vmatpush3.bf16.msra.mxu0 %v5371_v16  ;;  %3700 = vmatprep.mubr.msk.f32.mxu0 %vm4468_vm1, %v4469_v40  ;;  %vm1317_vm12 = vcmp.ge.f32.partialorder %v4395_v21, 0.0 }
 0x31a   :  { %v1297_v29 = vpop.f32.mrb[12].mxu1  ;;  %4235 = vmatprep.subr.bf16.mxu0 %v4467_v42 }
 0x31b   :  { %v4397_v32 = vadd.f32 %v4396_v25, %v1297_v29  ;;  %v3658_v33 = vpop.f32.mrb[13].mxu1  ;;  %v5395_v34 = vsel %vm1317_vm12, %v4395_v21, %v1323_v26  ;;  %v1547_v29 = vld [vmem:[%s5733_s9 + $0x10] sm:$0xff] }
 0x31c   :  { %3701 = vmatmul.mubr.f32.gmra.mrb[18].mxu0 %v5395_v34  ;;  %v4256_v35 = vpack.c.bf16 %v5395_v34, %v5379_v23  ;;  %v1551_v33 = vld [vmem:[%s5733_s9 + $0x30] sm:$0xff] }
 0x31d   :  { %v1324_v13 = vmul.f32 %v4397_v32, %v5362_v4  ;;  %4237 = vmatpush3.bf16.msra.mxu0 %v5386_v27  ;;  %3703 = vmatprep.mubr.msk.f32.mxu0 %vm4468_vm1, %v4469_v40  ;;  %vm1318_vm13 = vcmp.ge.f32.partialorder %v4397_v32, 0.0 }
 0x31e   :  { %v1302_v39 = vpop.f32.mrb[14].mxu1  ;;  %4257 = vmatprep.subr.bf16.mxu1 %v4256_v35  ;;  %4238 = vmatprep.subr.bf16.mxu0 %v4467_v42 }
 0x31f   :  { %v4399_v44 = vadd.f32 %v4398_v36, %v1302_v39  ;;  %v3661_v45 = vpop.f32.mrb[15].mxu1  ;;  %4259 = vmatpush3.bf16.msra.mxu1 %v4256_v35  ;;  %v1329_v11 = vsel %vm1318_vm13, %v4397_v32, %v1324_v13  ;;  %v1550_v32 = vld [vmem:[%s5733_s9 + $0x28] sm:$0xff]  ;;  %v2920_v35 = vld [vmem:[%s5733_s9 + $0x80] sm:$0xff] }
 0x320   :  { %3704 = vmatmul.mubr.f32.gmra.mrb[20].mxu0 %v1329_v11 }
 0x321   :  { %v1325_v3 = vmul.f32 %v4399_v44, %v5362_v4  ;;  %4240 = vmatpush3.bf16.msra.mxu0 %v5404_v37  ;;  %3706 = vmatprep.mubr.msk.f32.mxu0 %vm4468_vm1, %v4469_v40  ;;  %vm1319_vm14 = vcmp.ge.f32.partialorder %v4399_v44, 0.0 }
 0x322   :  { %v1307_v50 = vpop.f32.mrb[16].mxu1  ;;  %4241 = vmatprep.subr.bf16.mxu0 %v4467_v42 }
 0x323   :  { %v4401_v53 = vadd.f32 %v4400_v47, %v1307_v50  ;;  %v3664_v55 = vpop.f32.mrb[17].mxu1  ;;  %v1330_v56 = vsel %vm1319_vm14, %v4399_v44, %v1325_v3  ;;  %v2921_v50 = vld [vmem:[%s5733_s9 + $0x88] sm:$0xff] }
 0x324   :  { %3707 = vmatmul.mubr.f32.gmra.mrb[22].mxu0 %v1330_v56  ;;  %v4260_v59 = vpack.c.bf16 %v1330_v56, %v1329_v11  ;;  %v2925_v55 = vld [vmem:[%s5733_s9 + $0xa8] sm:$0xff] }
 0x325   :  { %vm1320_vm15 = vcmp.ge.f32.partialorder %v4401_v53, 0.0  ;;  %v1326_v60 = vmul.f32 %v4401_v53, %v5362_v4  ;;  %4243 = vmatpush3.bf16.msra.mxu0 %v5417_v48  ;;  %3709 = vmatprep.mubr.msk.f32.mxu0 %vm4468_vm1, %v4469_v40  ;;  %v2892_v4 = vld [vmem:[%s5737_s13 + $0xe0] sm:$0xff] }
 0x326   :  { %4261 = vmatprep.subr.bf16.mxu1 %v4260_v59  ;;  %4244 = vmatprep.subr.bf16.mxu0 %v4467_v42  ;;  %v5452_v7 = vpack.c.bf16 %v2893_v6, %v2892_v4 }
 0x327   :  { %4263 = vmatpush3.bf16.msra.mxu1 %v4260_v59  ;;  %v1331_v0 = vsel %vm1320_vm15, %v4401_v53, %v1326_v60  ;;  %v2924_v53 = vld [vmem:[%s5733_s9 + $0xa0] sm:$0xff] }
 0x328   :  { %3710 = vmatmul.mubr.f32.gmra.mrb[24].mxu0 %v1331_v0  ;;  %3767 = vmatprep.subr.mxu1 %v1331_v0 }
 0x329   :  { %4246 = vmatpush3.bf16.msra.mxu0 %v5430_v61  ;;  %3744 = vmatprep.mubr.msk.f32.mxu0 %vm4468_vm1, %v4469_v40 }
 0x32a   :  { %4247 = vmatprep.subr.bf16.mxu0 %v4467_v42 }
 0x32b   :  { %3768 = vmatpush3.msra.mxu1 %v1331_v0 }
 0x32d   :  { %4249 = vmatpush3.bf16.msra.mxu0 %v5440_v1 }
 0x32e   :  { %4250 = vmatprep.subr.bf16.mxu0 %v4467_v42 }
 0x331   :  { %4252 = vmatpush3.bf16.msra.mxu0 %v5452_v7 }
 0x332   :  { %4253 = vmatprep.subr.bf16.mxu0 %v4467_v42  ;;  %v2896_v42 = vld [vmem:[%s5733_s9 + $0x40] sm:$0xff] }
 0x333   :  { %3769 = vmatprep.mubr.msk.f32.mxu1 %vm1562_vm0, %v2896_v42 }
 0x335   :  { %4255 = vmatpush3.bf16.msra.mxu0 %v5462_v12 }
 0x336   :  { %4281 = vmatprep.subr.bf16.mxu0 %v5223_v2 }
 0x338   :  { %3745 = vmatmul.mubr.f32.vlgmr.msra.gmra.mrb[26].mxu0 %v5379_v23 }
 0x339   :  { %3747 = vmatprep.mubr.msk.f32.mxu0 %vm4468_vm1, %v4469_v40  ;;  %4283 = vmatpush3.bf16.msra.mxu0 %v5223_v2  ;;  %v2898_v2 = vld [vmem:[%s5733_s9 + $0x50] sm:$0xff] }
 0x33a   :  { %4285 = vmatprep.subr.bf16.mxu0 %v5229_v49 }
 0x33c   :  { %3748 = vmatmul.mubr.f32.gmra.mrb[28].mxu0 %v5395_v34  ;;  %v1552_v34 = vld [vmem:[%s5733_s9 + $0x38] sm:$0xff] }
 0x33d   :  { %3750 = vmatprep.mubr.msk.f32.mxu0 %vm4468_vm1, %v4469_v40  ;;  %4287 = vmatpush3.bf16.msra.mxu0 %v5229_v49  ;;  %v2899_v49 = vld [vmem:[%s5733_s9 + $0x58] sm:$0xff] }
 0x33e   :  { %4289 = vmatprep.subr.bf16.mxu0 %v5239_v51 }
 0x340   :  { %3751 = vmatmul.mubr.f32.gmra.mrb[30].mxu0 %v1329_v11 }
 0x341   :  { %3753 = vmatprep.mubr.msk.f32.mxu0 %vm4468_vm1, %v4469_v40  ;;  %4291 = vmatpush3.bf16.msra.mxu0 %v5239_v51  ;;  %v2900_v51 = vld [vmem:[%s5733_s9 + $0x60] sm:$0xff] }
 0x342   :  { %4293 = vmatprep.subr.bf16.mxu0 %v5249_v54 }
 0x344   :  { %3754 = vmatmul.mubr.f32.gmra.mrb[32].mxu0 %v1330_v56  ;;  %v2927_v56 = vld [vmem:[%s5733_s9 + $0xb8] sm:$0xff] }
 0x345   :  { %3756 = vmatprep.mubr.msk.f32.mxu0 %vm4468_vm1, %v4469_v40  ;;  %4295 = vmatpush3.bf16.msra.mxu0 %v5249_v54  ;;  %v2897_v40 = vld [vmem:[%s5733_s9 + $0x48] sm:$0xff] }
 0x346   :  { %4297 = vmatprep.subr.bf16.mxu0 %v5259_v58  ;;  %3770 = vmatmul.mubr.msk.f32.vlgmr.msra.gmra.mrb[18].mxu1 %vm1562_vm0, %v2897_v40  ;;  %v2901_v54 = vld [vmem:[%s5733_s9 + $0x68] sm:$0xff] }
 0x347   :  { %3772 = vmatprep.mubr.msk.f32.mxu1 %vm1562_vm0, %v2898_v2 }
 0x348   :  { %3757 = vmatmul.mubr.f32.gmra.mrb[34].mxu0 %v1331_v0 }
 0x349   :  { %4299 = vmatpush3.bf16.msra.mxu0 %v5259_v58  ;;  %v2902_v58 = vld [vmem:[%s5733_s9 + $0x70] sm:$0xff] }
 0x34a   :  { %4301 = vmatprep.subr.bf16.mxu0 %v5270_v8  ;;  %3773 = vmatmul.mubr.msk.f32.gmra.mrb[20].mxu1 %vm1562_vm0, %v2899_v49 }
 0x34b   :  { %3775 = vmatprep.mubr.msk.f32.mxu1 %vm1562_vm0, %v2900_v51 }
 0x34d   :  { %4303 = vmatpush3.bf16.msra.mxu0 %v5270_v8  ;;  %v2903_v8 = vld [vmem:[%s5733_s9 + $0x78] sm:$0xff] }
 0x34e   :  { %4305 = vmatprep.subr.bf16.mxu0 %v5281_v17  ;;  %3776 = vmatmul.mubr.msk.f32.gmra.mrb[22].mxu1 %vm1562_vm0, %v2901_v54 }
 0x34f   :  { %3778 = vmatprep.mubr.msk.f32.mxu1 %vm1562_vm0, %v2902_v58 }
 0x351   :  { %4307 = vmatpush3.bf16.msra.mxu0 %v5281_v17  ;;  %v1545_v17 = vld [vmem:[%s5733_s9] sm:$0xff] }
 0x352   :  { %4309 = vmatprep.subr.bf16.mxu0 %v5358_v57  ;;  %3779 = vmatmul.mubr.msk.f32.gmra.mrb[24].mxu1 %vm1562_vm0, %v2903_v8 }
 0x353   :  { %3791 = vmatprep.mubr.msk.f32.mxu1 %vm1562_vm0, %v1545_v17 }
 0x355   :  { %4311 = vmatpush3.bf16.msra.mxu0 %v5358_v57 }
 0x3eb   :  { %v1414_v57 = vpop.f32.mrb[16].mxu0 }
 0x3ec   :  { %v3699_v14 = vpop.f32.mrb[17].mxu0 }
 0x3ef   :  { %v1419_v15 = vpop.f32.mrb[18].mxu0 }
 0x3f0   :  { %v4264_v18 = vpack.c.bf16 %v1419_v15, %v1414_v57  ;;  %v3702_v19 = vpop.f32.mrb[19].mxu0 }
 0x3f2   :  { %4265 = vmatprep.subr.bf16.mxu1 %v4264_v18 }
 0x3f3   :  { %v1424_v20 = vpop.f32.mrb[20].mxu0  ;;  %4267 = vmatpush3.bf16.msra.mxu1 %v4264_v18 }
 0x3f4   :  { %v3705_v21 = vpop.f32.mrb[21].mxu0 }
 0x3f7   :  { %v1429_v22 = vpop.f32.mrb[22].mxu0 }
 0x3f8   :  { %v4268_v23 = vpack.c.bf16 %v1429_v22, %v1424_v20  ;;  %v3708_v24 = vpop.f32.mrb[23].mxu0 }
 0x3fa   :  { %4269 = vmatprep.subr.bf16.mxu1 %v4268_v23 }
 0x3fb   :  { %v1434_v25 = vpop.f32.mrb[24].mxu0  ;;  %4271 = vmatpush3.bf16.msra.mxu1 %v4268_v23 }
 0x3fc   :  { %v3711_v26 = vpop.f32.mrb[25].mxu0  ;;  %3789 = vmatprep.subr.mxu1 %v1434_v25 }
 0x3ff   :  { %3790 = vmatpush3.msra.mxu1 %v1434_v25 }
 0x400   :  { %3792 = vmatmul.mubr.msk.f32.vlgmr.msra.gmra.mrb[18].mxu1 %vm1562_vm0, %v1546_v28 }
 0x401   :  { %3794 = vmatprep.mubr.msk.f32.mxu1 %vm1562_vm0, %v1547_v29 }
 0x404   :  { %3795 = vmatmul.mubr.msk.f32.gmra.mrb[20].mxu1 %vm1562_vm0, %v1548_v30 }
 0x405   :  { %3797 = vmatprep.mubr.msk.f32.mxu1 %vm1562_vm0, %v1549_v31 }
 0x408   :  { %3798 = vmatmul.mubr.msk.f32.gmra.mrb[22].mxu1 %vm1562_vm0, %v1550_v32 }
 0x409   :  { %3800 = vmatprep.mubr.msk.f32.mxu1 %vm1562_vm0, %v1551_v33 }
 0x40b   :  { %v1521_v36 = vpop.f32.mrb[26].mxu0 }
 0x40c   :  { %v3746_v13 = vpop.f32.mrb[27].mxu0  ;;  %3801 = vmatmul.mubr.msk.f32.gmra.mrb[24].mxu1 %vm1562_vm0, %v1552_v34 }
 0x40d   :  { %3813 = vmatprep.mubr.msk.f32.mxu1 %vm1562_vm0, %v2920_v35  ;;  %v2936_v13 = vld [vmem:[%s5735_s11 + $0x40] sm:$0xff] }
 0x40f   :  { %v1526_v38 = vpop.f32.mrb[28].mxu0 }
 0x410   :  { %v4272_v39 = vpack.c.bf16 %v1526_v38, %v1521_v36  ;;  %v3749_v41 = vpop.f32.mrb[29].mxu0  ;;  %v2258_v36 = vld [vmem:[%s5735_s11] sm:$0xff]  ;;  %v2937_v38 = vld [vmem:[%s5735_s11 + $0x48] sm:$0xff] }
 0x411   :  { %v2939_v41 = vld [vmem:[%s5735_s11 + $0x58] sm:$0xff] }
 0x412   :  { %4273 = vmatprep.subr.bf16.mxu1 %v4272_v39 }
 0x413   :  { %v1531_v43 = vpop.f32.mrb[30].mxu0  ;;  %4275 = vmatpush3.bf16.msra.mxu1 %v4272_v39  ;;  %v2938_v39 = vld [vmem:[%s5735_s11 + $0x50] sm:$0xff] }
 0x414   :  { %v3752_v44 = vpop.f32.mrb[31].mxu0 }
 0x415   :  { %v2941_v44 = vld [vmem:[%s5735_s11 + $0x68] sm:$0xff] }
 0x417   :  { %v1536_v45 = vpop.f32.mrb[32].mxu0 }
 0x418   :  { %v4276_v11 = vpack.c.bf16 %v1536_v45, %v1531_v43  ;;  %v3755_v46 = vpop.f32.mrb[33].mxu0  ;;  %v2940_v43 = vld [vmem:[%s5735_s11 + $0x60] sm:$0xff]  ;;  %v2942_v45 = vld [vmem:[%s5735_s11 + $0x70] sm:$0xff] }
 0x41a   :  { %4277 = vmatprep.subr.bf16.mxu1 %v4276_v11 }
 0x41b   :  { %v1541_v47 = vpop.f32.mrb[34].mxu0  ;;  %4279 = vmatpush3.bf16.msra.mxu1 %v4276_v11  ;;  %v2943_v11 = vld [vmem:[%s5735_s11 + $0x78] sm:$0xff] }
 0x41c   :  { %v3758_v3 = vpop.f32.mrb[35].mxu0  ;;  %3811 = vmatprep.subr.mxu1 %v1541_v47 }
 0x41f   :  { %3812 = vmatpush3.msra.mxu1 %v1541_v47 }
 0x420   :  { %3814 = vmatmul.mubr.msk.f32.vlgmr.msra.gmra.mrb[18].mxu1 %vm1562_vm0, %v2921_v50  ;;  %4313 = vmatprep.subr.bf16.mxu1 %v5371_v16 }
 0x421   :  { %3816 = vmatprep.mubr.msk.f32.mxu1 %vm1562_vm0, %v2922_v5  ;;  %4315 = vmatpush3.bf16.msra.mxu1 %v5371_v16  ;;  %v2926_v16 = vld [vmem:[%s5733_s9 + $0xb0] sm:$0xff]  ;;  %s2869_s9 = sld [smem:[#allocation2 + $0x2]] }
 0x422   :  { %4317 = vmatprep.subr.bf16.mxu1 %v5386_v27 }
 0x424   :  { %3817 = vmatmul.mubr.msk.f32.gmra.mrb[20].mxu1 %vm1562_vm0, %v2923_v52 }
 0x425   :  { %3819 = vmatprep.mubr.msk.f32.mxu1 %vm1562_vm0, %v2924_v53  ;;  %4319 = vmatpush3.bf16.msra.mxu1 %v5386_v27  ;;  %v1983_v27 = vpop.permute.xlu1 %1982 }
 0x426   :  { %4321 = vmatprep.subr.bf16.mxu1 %v5404_v37 }
 0x427   :  { %v2031_v60 = vstv %s2869_s9 }
 0x428   :  { %3820 = vmatmul.mubr.msk.f32.gmra.mrb[22].mxu1 %vm1562_vm0, %v2925_v55 }
 0x429   :  { %3822 = vmatprep.mubr.msk.f32.mxu1 %vm1562_vm0, %v2926_v16  ;;  %4323 = vmatpush3.bf16.msra.mxu1 %v5404_v37  ;;  %v1978_v37 = vpop.permute.xlu0 %1977 }
 0x42a   :  { %4325 = vmatprep.subr.bf16.mxu1 %v5417_v48 }
 0x42c   :  { %3823 = vmatmul.mubr.msk.f32.gmra.mrb[24].mxu1 %vm1562_vm0, %v2927_v56 }
 0x42d   :  { %4327 = vmatpush3.bf16.msra.mxu1 %v5417_v48  ;;  %v1993_v48 = vpop.permute.xlu1 %1992  ;;  %v1988_v62 = vpop.permute.xlu0 %1987 }
 0x42e   :  { %4329 = vmatprep.subr.bf16.mxu1 %v5430_v61 }
 0x431   :  { %4331 = vmatpush3.bf16.msra.mxu1 %v5430_v61  ;;  %v2003_v42 = vpop.permute.xlu1 %2002  ;;  %v1998_v2 = vpop.permute.xlu0 %1997 }
 0x432   :  { %4333 = vmatprep.subr.bf16.mxu1 %v5440_v1 }
 0x435   :  { %4335 = vmatpush3.bf16.msra.mxu1 %v5440_v1  ;;  %v2013_v20 = vpop.permute.xlu1 %2012  ;;  %v2008_v23 = vpop.permute.xlu0 %2007 }
 0x436   :  { %4337 = vmatprep.subr.bf16.mxu1 %v5452_v7 }
 0x439   :  { %4339 = vmatpush3.bf16.msra.mxu1 %v5452_v7 }
 0x43a   :  { %4341 = vmatprep.subr.bf16.mxu1 %v5462_v12 }
 0x43d   :  { %4343 = vmatpush3.bf16.msra.mxu1 %v5462_v12 }
 0x4f3   :  { %v3815_v59 = vpop.f32.mrb[18].mxu1 }
 0x4f4   :  { %v2016_v61 = vadd.f32 %v3815_v59, %v1983_v27  ;;  %v1920_v63 = vpop.f32.mrb[19].mxu1 }
 0x4f5   :  { %v2015_v0 = vadd.f32 %v1978_v37, %v1920_v63 }
 0x4f6   :  { %vm2024_vm1 = vcmp.ge.f32.partialorder %v2016_v61, 0.0  ;;  %v2033_v1 = vmul.f32 %v2031_v60, %v2016_v61 }
 0x4f7   :  { %v2032_v4 = vmul.f32 %v2031_v60, %v2015_v0  ;;  %v3818_v6 = vpop.f32.mrb[20].mxu1  ;;  %vm2023_vm2 = vcmp.ge.f32.partialorder %v2015_v0, 0.0 }
 0x4f8   :  { %v2041_v7 = vsel %vm2024_vm1, %v2016_v61, %v2033_v1  ;;  %v2018_v9 = vadd.f32 %v3818_v6, %v1993_v48  ;;  %v1930_v10 = vpop.f32.mrb[21].mxu1 }
 0x4f9   :  { %v2017_v12 = vadd.f32 %v1988_v62, %v1930_v10  ;;  %v2040_v40 = vsel %vm2023_vm2, %v2015_v0, %v2032_v4  ;;  %v2259_v10 = vld [vmem:[%s5735_s11 + $0x8] sm:$0xff] }
 0x4fa   :  { %v2035_v49 = vmul.f32 %v2031_v60, %v2018_v9  ;;  %3857 = vmatprep.mubr.f32.mxu0 %v2040_v40  ;;  %3901 = vmatprep.mubr.f32.mxu1 %v2040_v40  ;;  %v4344_v51 = vpack.c.bf16 %v2041_v7, %v2040_v40  ;;  %vm2026_vm3 = vcmp.ge.f32.partialorder %v2018_v9, 0.0  ;;  %v2262_v40 = vld [vmem:[%s5735_s11 + $0x20] sm:$0xff] }
 0x4fb   :  { %v2034_v54 = vmul.f32 %v2031_v60, %v2017_v12  ;;  %v3821_v58 = vpop.f32.mrb[22].mxu1  ;;  %3858 = vmatmul.mubr.f32.vlgmr.msra.gmra.mrb[36].mxu0 %v2041_v7  ;;  %3902 = vmatmul.mubr.f32.vlgmr.msra.gmra.mrb[26].mxu1 %v2041_v7  ;;  %vm2025_vm4 = vcmp.ge.f32.partialorder %v2017_v12, 0.0 }
 0x4fc   :  { %v2020_v8 = vadd.f32 %v3821_v58, %v2003_v42  ;;  %v1940_v17 = vpop.f32.mrb[23].mxu1  ;;  %4345 = vmatprep.subr.bf16.mxu1 %v4344_v51  ;;  %v2043_v57 = vsel %vm2026_vm3, %v2018_v9, %v2035_v49  ;;  %v2260_v42 = vld [vmem:[%s5735_s11 + $0x10] sm:$0xff]  ;;  %v2961_v58 = vld [vmem:[%s5735_s11 + $0x88] sm:$0xff] }
 0x4fd   :  { %v2019_v14 = vadd.f32 %v1998_v2, %v1940_v17  ;;  %4347 = vmatpush3.bf16.msra.mxu1 %v4344_v51  ;;  %v2042_v15 = vsel %vm2025_vm4, %v2017_v12, %v2034_v54  ;;  %v2261_v12 = vld [vmem:[%s5735_s11 + $0x18] sm:$0xff]  ;;  %v2263_v2 = vld [vmem:[%s5735_s11 + $0x28] sm:$0xff]  ;;  %v2264_v49 = vld [vmem:[%s5735_s11 + $0x30] sm:$0xff] }
 0x4fe   :  { %v2037_v18 = vmul.f32 %v2031_v60, %v2020_v8  ;;  %3860 = vmatprep.mubr.f32.mxu0 %v2042_v15  ;;  %3904 = vmatprep.mubr.f32.mxu1 %v2042_v15  ;;  %v4348_v19 = vpack.c.bf16 %v2043_v57, %v2042_v15  ;;  %vm2028_vm5 = vcmp.ge.f32.partialorder %v2020_v8, 0.0  ;;  %v2265_v51 = vld [vmem:[%s5735_s11 + $0x38] sm:$0xff]  ;;  %v2960_v54 = vld [vmem:[%s5735_s11 + $0x80] sm:$0xff]  ;;  %v2966_v15 = vld [vmem:[%s5735_s11 + $0xb0] sm:$0xff] }
 0x4ff   :  { %v2036_v21 = vmul.f32 %v2031_v60, %v2019_v14  ;;  %v3824_v22 = vpop.f32.mrb[24].mxu1  ;;  %3861 = vmatmul.mubr.f32.gmra.mrb[38].mxu0 %v2043_v57  ;;  %3905 = vmatmul.mubr.f32.gmra.mrb[28].mxu1 %v2043_v57  ;;  %vm2027_vm6 = vcmp.ge.f32.partialorder %v2019_v14, 0.0  ;;  %v2963_v17 = vld [vmem:[%s5735_s11 + $0x98] sm:$0xff]  ;;  %v2964_v57 = vld [vmem:[%s5735_s11 + $0xa0] sm:$0xff] }
 0x500   :  { %v2022_v24 = vadd.f32 %v3824_v22, %v2013_v20  ;;  %v1950_v25 = vpop.f32.mrb[25].mxu1  ;;  %4349 = vmatprep.subr.bf16.mxu1 %v4348_v19  ;;  %v2045_v26 = vsel %vm2028_vm5, %v2020_v8, %v2037_v18  ;;  %v2962_v8 = vld [vmem:[%s5735_s11 + $0x90] sm:$0xff]  ;;  %v2967_v18 = vld [vmem:[%s5735_s11 + $0xb8] sm:$0xff] }
 0x501   :  { %v2021_v28 = vadd.f32 %v2008_v23, %v1950_v25  ;;  %4351 = vmatpush3.bf16.msra.mxu1 %v4348_v19  ;;  %v2044_v29 = vsel %vm2027_vm6, %v2019_v14, %v2036_v21  ;;  %v2965_v14 = vld [vmem:[%s5735_s11 + $0xa8] sm:$0xff] }
 0x502   :  { %v2039_v30 = vmul.f32 %v2031_v60, %v2022_v24  ;;  %3863 = vmatprep.mubr.f32.mxu0 %v2044_v29  ;;  %3907 = vmatprep.mubr.f32.mxu1 %v2044_v29  ;;  %v4352_v31 = vpack.c.bf16 %v2045_v26, %v2044_v29  ;;  %vm2030_vm7 = vcmp.ge.f32.partialorder %v2022_v24, 0.0  ;;  %v2690_v29 = vpop.permute.xlu0 %2689 }
 0x503   :  { %v2038_v32 = vmul.f32 %v2031_v60, %v2021_v28  ;;  %3864 = vmatmul.mubr.f32.gmra.mrb[40].mxu0 %v2045_v26  ;;  %3908 = vmatmul.mubr.f32.gmra.mrb[30].mxu1 %v2045_v26  ;;  %vm2029_vm8 = vcmp.ge.f32.partialorder %v2021_v28, 0.0 }
 0x504   :  { %4353 = vmatprep.subr.bf16.mxu1 %v4352_v31  ;;  %v2047_v33 = vsel %vm2030_vm7, %v2022_v24, %v2039_v30 }
 0x505   :  { %4355 = vmatpush3.bf16.msra.mxu1 %v4352_v31  ;;  %v2046_v34 = vsel %vm2029_vm8, %v2021_v28, %v2038_v32  ;;  %v2695_v28 = vpop.permute.xlu1 %2694 }
 0x506   :  { %3866 = vmatprep.mubr.f32.mxu0 %v2046_v34  ;;  %3910 = vmatprep.mubr.f32.mxu1 %v2046_v34  ;;  %v4356_v35 = vpack.c.bf16 %v2047_v33, %v2046_v34 }
 0x507   :  { %3867 = vmatmul.mubr.f32.gmra.mrb[42].mxu0 %v2047_v33  ;;  %3911 = vmatmul.mubr.f32.gmra.mrb[32].mxu1 %v2047_v33 }
 0x508   :  { %4357 = vmatprep.subr.bf16.mxu1 %v4356_v35  ;;  %3957 = vmatprep.mubr.msk.f32.mxu0 %vm1065_vm10, %v2258_v36 }
 0x509   :  { %4359 = vmatpush3.bf16.msra.mxu1 %v4356_v35  ;;  %3929 = vmatprep.mubr.msk.f32.mxu1 %vm1065_vm10, %v2936_v13  ;;  %v2705_v33 = vpop.permute.xlu1 %2704  ;;  %v2700_v35 = vpop.permute.xlu0 %2699 }
 0x50c   :  { %3930 = vmatmul.mubr.msk.f32.vlgmr.msra.gmra.mrb[34].mxu1 %vm1065_vm10, %v2937_v38 }
 0x50d   :  { %3932 = vmatprep.mubr.msk.f32.mxu1 %vm1065_vm10, %v2938_v39 }
 0x510   :  { %3933 = vmatmul.mubr.msk.f32.gmra.mrb[36].mxu1 %vm1065_vm10, %v2939_v41 }
 0x511   :  { %3935 = vmatprep.mubr.msk.f32.mxu1 %vm1065_vm10, %v2940_v43 }
 0x514   :  { %3936 = vmatmul.mubr.msk.f32.gmra.mrb[38].mxu1 %vm1065_vm10, %v2941_v44 }
 0x515   :  { %3938 = vmatprep.mubr.msk.f32.mxu1 %vm1065_vm10, %v2942_v45  ;;  %v2715_v45 = vpop.permute.xlu1 %2714 }
 0x518   :  { %3939 = vmatmul.mubr.msk.f32.gmra.mrb[40].mxu1 %vm1065_vm10, %v2943_v11 }
 0x5ce   :  { %v3859_v46 = vpop.f32.mrb[36].mxu0  ;;  %v3903_v47 = vpop.f32.mrb[26].mxu1 }
 0x5cf   :  { %v2114_v3 = vpop.f32.mrb[37].mxu0  ;;  %v2219_v50 = vpop.f32.mrb[27].mxu1 }
 0x5d0   :  { %v4360_v5 = vpack.c.bf16 %v3859_v46, %v2114_v3  ;;  %v4376_v52 = vpack.c.bf16 %v3903_v47, %v2219_v50  ;;  %v2710_v47 = vpop.permute.xlu0 %2709 }
 0x5d2   :  { %v3862_v53 = vpop.f32.mrb[38].mxu0  ;;  %v3906_v55 = vpop.f32.mrb[28].mxu1  ;;  %4361 = vmatprep.subr.bf16.mxu0 %v4360_v5 }
 0x5d3   :  { %v2124_v16 = vpop.f32.mrb[39].mxu0  ;;  %v2229_v56 = vpop.f32.mrb[29].mxu1  ;;  %4363 = vmatpush3.bf16.msra.mxu0 %v4360_v5 }
 0x5d4   :  { %v4364_v27 = vpack.c.bf16 %v3862_v53, %v2124_v16  ;;  %v4380_v37 = vpack.c.bf16 %v3906_v55, %v2229_v56 }
 0x5d6   :  { %v3865_v48 = vpop.f32.mrb[40].mxu0  ;;  %v3909_v59 = vpop.f32.mrb[30].mxu1  ;;  %4365 = vmatprep.subr.bf16.mxu0 %v4364_v27 }
 0x5d7   :  { %v2134_v60 = vpop.f32.mrb[41].mxu0  ;;  %v2239_v62 = vpop.f32.mrb[31].mxu1  ;;  %4367 = vmatpush3.bf16.msra.mxu0 %v4364_v27 }
 0x5d8   :  { %v4368_v61 = vpack.c.bf16 %v3865_v48, %v2134_v60  ;;  %v4384_v63 = vpack.c.bf16 %v3909_v59, %v2239_v62  ;;  %v2725_v27 = vpop.permute.xlu1 %2724  ;;  %v2720_v48 = vpop.permute.xlu0 %2719 }
 0x5da   :  { %v3868_v0 = vpop.f32.mrb[42].mxu0  ;;  %v3912_v1 = vpop.f32.mrb[32].mxu1  ;;  %4369 = vmatprep.subr.bf16.mxu0 %v4368_v61 }
 0x5db   :  { %v2144_v4 = vpop.f32.mrb[43].mxu0  ;;  %v2249_v6 = vpop.f32.mrb[33].mxu1  ;;  %4371 = vmatpush3.bf16.msra.mxu0 %v4368_v61 }
 0x5dc   :  { %v4372_v7 = vpack.c.bf16 %v3868_v0, %v2144_v4  ;;  %v4388_v9 = vpack.c.bf16 %v3912_v1, %v2249_v6 }
 0x5de   :  { %4373 = vmatprep.subr.bf16.mxu0 %v4372_v7 }
 0x5df   :  { %4375 = vmatpush3.bf16.msra.mxu0 %v4372_v7  ;;  %v3931_v19 = vpop.f32.mrb[34].mxu1 }
 0x5e0   :  { %4377 = vmatprep.subr.bf16.mxu0 %v4376_v52  ;;  %v2365_v20 = vpop.f32.mrb[35].mxu1 }
 0x5e2   :  { %3958 = vmatmul.mubr.msk.f32.vlgmr.msra.gmra.mrb[44].mxu0 %vm1065_vm10, %v2259_v10 }
 0x5e3   :  { %4379 = vmatpush3.bf16.msra.mxu0 %v4376_v52  ;;  %3960 = vmatprep.mubr.msk.f32.mxu0 %vm1065_vm10, %v2260_v42  ;;  %v3934_v21 = vpop.f32.mrb[36].mxu1 }
 0x5e4   :  { %4381 = vmatprep.subr.bf16.mxu0 %v4380_v37  ;;  %v2375_v22 = vpop.f32.mrb[37].mxu1 }
 0x5e6   :  { %3961 = vmatmul.mubr.msk.f32.gmra.mrb[46].mxu0 %vm1065_vm10, %v2261_v12 }
 0x5e7   :  { %4383 = vmatpush3.bf16.msra.mxu0 %v4380_v37  ;;  %3963 = vmatprep.mubr.msk.f32.mxu0 %vm1065_vm10, %v2262_v40  ;;  %v3937_v23 = vpop.f32.mrb[38].mxu1 }
 0x5e8   :  { %4385 = vmatprep.subr.bf16.mxu0 %v4384_v63  ;;  %v2385_v24 = vpop.f32.mrb[39].mxu1 }
 0x5ea   :  { %3964 = vmatmul.mubr.msk.f32.gmra.mrb[48].mxu0 %vm1065_vm10, %v2263_v2 }
 0x5eb   :  { %4387 = vmatpush3.bf16.msra.mxu0 %v4384_v63  ;;  %3966 = vmatprep.mubr.msk.f32.mxu0 %vm1065_vm10, %v2264_v49  ;;  %v3940_v25 = vpop.f32.mrb[40].mxu1 }
 0x5ec   :  { %4389 = vmatprep.subr.bf16.mxu0 %v4388_v9  ;;  %v2395_v26 = vpop.f32.mrb[41].mxu1 }
 0x5ee   :  { %3967 = vmatmul.mubr.msk.f32.gmra.mrb[50].mxu0 %vm1065_vm10, %v2265_v51 }
 0x5ef   :  { %4391 = vmatpush3.bf16.msra.mxu0 %v4388_v9  ;;  %3985 = vmatprep.mubr.msk.f32.mxu0 %vm1065_vm10, %v2960_v54 }
 0x5f2   :  { %3986 = vmatmul.mubr.msk.f32.vlgmr.msra.gmra.mrb[44].mxu0 %vm1065_vm10, %v2961_v58 }
 0x5f3   :  { %3988 = vmatprep.mubr.msk.f32.mxu0 %vm1065_vm10, %v2962_v8 }
 0x5f6   :  { %3989 = vmatmul.mubr.msk.f32.gmra.mrb[46].mxu0 %vm1065_vm10, %v2963_v17 }
 0x5f7   :  { %3991 = vmatprep.mubr.msk.f32.mxu0 %vm1065_vm10, %v2964_v57 }
 0x5fa   :  { %3992 = vmatmul.mubr.msk.f32.gmra.mrb[48].mxu0 %vm1065_vm10, %v2965_v14 }
 0x5fb   :  { %3994 = vmatprep.mubr.msk.f32.mxu0 %vm1065_vm10, %v2966_v15 }
 0x5fe   :  { %3995 = vmatmul.mubr.msk.f32.gmra.mrb[50].mxu0 %vm1065_vm10, %v2967_v18 }
 0x6c5   :  { %v3987_v30 = vpop.f32.mrb[44].mxu0 }
 0x6c6   :  { %v4402_v31 = vadd.f32 %v3987_v30, %v3931_v19  ;;  %v2632_v32 = vpop.f32.mrb[45].mxu0 }
 0x6c7   :  { %v4403_v34 = vadd.f32 %v2632_v32, %v2365_v20 }
 0x6c8   :  { %v2728_v36 = vadd.f32 %v4402_v31, %v2695_v28 }
 0x6c9   :  { %v2727_v13 = vadd.f32 %v4403_v34, %v2690_v29  ;;  %v3990_v38 = vpop.f32.mrb[46].mxu0 }
 0x6ca   :  { %2736 = vst [vmem:[%s5739_s15 + $0x8] sm:$0xff] %v2728_v36  ;;  %v4404_v39 = vadd.f32 %v3990_v38, %v3934_v21  ;;  %v2642_v41 = vpop.f32.mrb[47].mxu0 }
 0x6cb   :  { %2735 = vst [vmem:[%s5739_s15] sm:$0xff] %v2727_v13  ;;  %v4405_v43 = vadd.f32 %v2642_v41, %v2375_v22 }
 0x6cc   :  { %v2730_v44 = vadd.f32 %v4404_v39, %v2705_v33 }
 0x6cd   :  { %v2729_v11 = vadd.f32 %v4405_v43, %v2700_v35  ;;  %v3993_v46 = vpop.f32.mrb[48].mxu0 }
 0x6ce   :  { %2738 = vst [vmem:[%s5739_s15 + $0x18] sm:$0xff] %v2730_v44  ;;  %v4406_v3 = vadd.f32 %v3993_v46, %v3937_v23  ;;  %v2652_v50 = vpop.f32.mrb[49].mxu0 }
 0x6cf   :  { %2737 = vst [vmem:[%s5739_s15 + $0x10] sm:$0xff] %v2729_v11  ;;  %v4407_v5 = vadd.f32 %v2652_v50, %v2385_v24 }
 0x6d0   :  { %v2732_v52 = vadd.f32 %v4406_v3, %v2715_v45 }
 0x6d1   :  { %v2731_v53 = vadd.f32 %v4407_v5, %v2710_v47  ;;  %v3996_v55 = vpop.f32.mrb[50].mxu0 }
 0x6d2   :  { %2740 = vst [vmem:[%s5739_s15 + $0x28] sm:$0xff] %v2732_v52  ;;  %v4408_v16 = vadd.f32 %v3996_v55, %v3940_v25  ;;  %v2662_v56 = vpop.f32.mrb[51].mxu0 }
 0x6d3   :  { %2739 = vst [vmem:[%s5739_s15 + $0x20] sm:$0xff] %v2731_v53  ;;  %v4409_v37 = vadd.f32 %v2662_v56, %v2395_v26 }
 0x6d4   :  { %v2734_v59 = vadd.f32 %v4408_v16, %v2725_v27 }
 0x6d5   :  { %v2733_v60 = vadd.f32 %v4409_v37, %v2720_v48 }
 0x6d6   :  { %2742 = vst [vmem:[%s5739_s15 + $0x38] sm:$0xf] %v2734_v59 }
 0x6d7   :  { %2741 = vst [vmem:[%s5739_s15 + $0x30] sm:$0xff] %v2733_v60 }
 0x6d8   :  { %2747 = vsyncpa [#allocation3], 1 }

</bundles_post_ra>
